<compile_context>
chip_gen: v6e
topology: v6e:2x2x1
jax: 0.10.0
libtpu: 0.0.40
codegen_flags: <defaults>
</compile_context>

<pallas_src>
import functools

import jax
import jax.numpy as jnp
from jax.experimental import pallas as pl
from jax.experimental.pallas import tpu as pltpu


def _gated_resblock_kernel(x_ref, w1_ref, b1_ref, w2_ref, b2_ref,
                           w3_ref, b3_ref, o_ref, *, H, W):
    """x_ref: (N*C, H*W).  wK_ref: (N*C, 9*N*C) block-diag weights.  bK_ref: (N*C, 1)."""
    HW = H * W
    NC = x_ref.shape[0]
    f32 = jnp.float32

    # One packed load of the whole input tile (2 full vld's).
    x = x_ref[...].astype(f32)                              # (NC, HW)

    # Flat lane position -> (row, col) of the original HxW image.
    pos = jax.lax.broadcasted_iota(jnp.int32, (NC, HW), 1)
    if W & (W - 1) == 0:                                    # power-of-two fast path
        row = pos >> (W.bit_length() - 1)
        col = pos & (W - 1)
    else:
        row = pos // W
        col = pos - row * W

    taps = [(dy, dx) for dy in (-1, 0, 1) for dx in (-1, 0, 1)]

    def tap_mask(dy, dx):
        conds = []
        if dy == -1:
            conds.append(row >= 1)
        if dy == 1:
            conds.append(row <= H - 2)
        if dx == -1:
            conds.append(col >= 1)
        if dx == 1:
            conds.append(col <= W - 2)
        if not conds:
            return None
        m = conds[0]
        for c in conds[1:]:
            m = jnp.logical_and(m, c)
        return m

    # Masks hoisted: computed once, reused by both im2col passes (x and gated).
    masks = [tap_mask(dy, dx) for dy, dx in taps]

    def build_stack(v):
        """im2col stack of the packed block: one roll + one select per tap."""
        parts = []
        for (dy, dx), m in zip(taps, masks):
            off = dy * W + dx
            s = v if off == 0 else pltpu.roll(v, shift=(-off) % HW, axis=1)
            if m is not None:
                s = jnp.where(m, s, 0.0)
            parts.append(s)
        return jnp.concatenate(parts, axis=0)               # (9*NC, HW)

    def matmul(w_ref, b_ref, stack):
        y = jnp.dot(w_ref[...], stack,
                    precision=jax.lax.Precision.HIGHEST,
                    preferred_element_type=f32)             # (NC, HW)
        return y + b_ref[...]                               # lane-broadcast bias

    # conv1 & conv2 share the same im2col stack.
    stack_x = build_stack(x)
    c1 = matmul(w1_ref, b1_ref, stack_x)
    c2 = matmul(w2_ref, b2_ref, stack_x)
    gated = jax.nn.sigmoid(c1) * jnp.tanh(c2)               # packed EUP streams

    # conv3 on the gated block, relu, identity shortcut, single full-tile store.
    stack_g = build_stack(gated)
    res = jnp.maximum(matmul(w3_ref, b3_ref, stack_g), 0.0)
    o_ref[...] = (x + res).astype(o_ref.dtype)


def residual_block_gated(x_nchw, params):
    """Gated ResidualBlock forward (identity shortcut). Input/output in NCHW."""
    w1, b1, w2, b2, w3, b3 = params      # HWIO weights (3,3,Cin,Cout), (Cout,) biases
    N, Cin, H, W = x_nchw.shape
    Cout = w1.shape[-1]
    assert Cin == Cout, "this configuration uses the identity shortcut"
    HW = H * W
    NC = N * Cin

    # Pure reshape: batch+channels packed onto sublanes, H*W on lanes.
    x_packed = x_nchw.reshape(NC, HW).astype(jnp.float32)

    # Host-side weight relayout: block-diagonal over the batch so each conv is a
    # single (N*Cout, 9*N*Cin) x (9*N*Cin, HW) matmul on the packed im2col stack.
    #   W_big[n*Cout+co, (t*N + n)*Cin + ci] = w[ky, kx, ci, co],  t = ky*3 + kx
    eye = jnp.eye(N, dtype=jnp.float32)

    def big_w(w):
        w_tc = w.reshape(9, Cin, Cout).astype(jnp.float32)          # (t, ci, co)
        wb = jnp.einsum('nm,tic->nctmi', eye, w_tc)                  # (N,Cout,9,N,Cin)
        return wb.reshape(N * Cout, 9 * N * Cin)

    def big_b(b):
        return jnp.tile(b.astype(jnp.float32), N).reshape(N * Cout, 1)

    W1, W2, W3 = big_w(w1), big_w(w2), big_w(w3)
    B1, B2, B3 = big_b(b1), big_b(b2), big_b(b3)

    kernel = functools.partial(_gated_resblock_kernel, H=H, W=W)
    vmem = pl.BlockSpec(memory_space=pltpu.MemorySpace.VMEM)

    out_packed = pl.pallas_call(
        kernel,
        out_shape=jax.ShapeDtypeStruct((NC, HW), x_nchw.dtype),
        in_specs=[vmem] * 7,
        out_specs=vmem,
    )(x_packed, W1, B1, W2, B2, W3, B3)

    return out_packed.reshape(N, Cout, H, W)


def _reference(x_nchw, params):
    """Pure-JAX reference for correctness checking."""
    w1, b1, w2, b2, w3, b3 = params
    dn = ('NCHW', 'HWIO', 'NCHW')

    def conv(v, w, b):
        y = jax.lax.conv_general_dilated(v, w, (1, 1), 'SAME',
                                         dimension_numbers=dn)
        return y + b.reshape(1, -1, 1, 1)

    c1 = conv(x_nchw, w1, b1)
    c2 = conv(x_nchw, w2, b2)
    gated = jax.nn.sigmoid(c1) * jnp.tanh(c2)
    res = jnp.maximum(conv(gated, w3, b3), 0.0)
    return x_nchw + res


if __name__ == "__main__":
    # Small shapes consistent with the module: batch=2, channels=4, spatial=16.
    N, C, H, W = 2, 4, 16, 16
    key = jax.random.PRNGKey(0)
    kx, k1, k2, k3, kb1, kb2, kb3 = jax.random.split(key, 7)

    x = jax.random.normal(kx, (N, C, H, W), dtype=jnp.float32)

    # Deterministic synthetic parameters (HWIO conv weights, per-channel bias).
    w1 = 0.1 * jax.random.normal(k1, (3, 3, C, C), dtype=jnp.float32)
    w2 = 0.1 * jax.random.normal(k2, (3, 3, C, C), dtype=jnp.float32)
    w3 = 0.1 * jax.random.normal(k3, (3, 3, C, C), dtype=jnp.float32)
    b1 = 0.1 * jax.random.normal(kb1, (C,), dtype=jnp.float32)
    b2 = 0.1 * jax.random.normal(kb2, (C,), dtype=jnp.float32)
    b3 = 0.1 * jax.random.normal(kb3, (C,), dtype=jnp.float32)
    params = (w1, b1, w2, b2, w3, b3)

    out = jax.block_until_ready(residual_block_gated(x, params))
    ref = jax.block_until_ready(_reference(x, params))

    assert out.shape == (N, C, H, W)
    assert jnp.allclose(out, ref, atol=1e-4, rtol=1e-4), "mismatch vs reference"

    print("KERNEL_OK")
</pallas_src>

<mosaic_0001>
module attributes {stable_mosaic.version = 11 : i64} {
  func.func @_gated_resblock_kernel(%arg0: memref<8x256xf32, #tpu.memory_space<vmem>>, %arg1: memref<8x72xf32, #tpu.memory_space<vmem>>, %arg2: memref<8x1xf32, #tpu.memory_space<vmem>>, %arg3: memref<8x72xf32, #tpu.memory_space<vmem>>, %arg4: memref<8x1xf32, #tpu.memory_space<vmem>>, %arg5: memref<8x72xf32, #tpu.memory_space<vmem>>, %arg6: memref<8x1xf32, #tpu.memory_space<vmem>>, %arg7: memref<8x256xf32, #tpu.memory_space<vmem>>) attributes {dimension_semantics = [], scalar_prefetch = 0 : i64, scratch_operands = 0 : i64, tpu.core_type = #tpu.core_type<tc>} {
    %c0 = arith.constant 0 : index
    %c0_0 = arith.constant 0 : index
    %0 = vector.load %arg0[%c0, %c0_0] : memref<8x256xf32, #tpu.memory_space<vmem>>, vector<8x256xf32>
    %1 = tpu.iota {dimensions = array<i32: 1>} : vector<8x256xi32>
    %c4_i32 = arith.constant 4 : i32
    %2 = vector.broadcast %c4_i32 : i32 to vector<8x256xi32>
    %3 = arith.shrsi %1, %2 : vector<8x256xi32>
    %c15_i32 = arith.constant 15 : i32
    %4 = vector.broadcast %c15_i32 : i32 to vector<8x256xi32>
    %5 = arith.andi %1, %4 : vector<8x256xi32>
    %c1_i32 = arith.constant 1 : i32
    %6 = vector.broadcast %c1_i32 : i32 to vector<8x256xi32>
    %7 = arith.cmpi sge, %3, %6 : vector<8x256xi32>
    %c1_i32_1 = arith.constant 1 : i32
    %8 = vector.broadcast %c1_i32_1 : i32 to vector<8x256xi32>
    %9 = arith.cmpi sge, %5, %8 : vector<8x256xi32>
    %10 = arith.andi %7, %9 : vector<8x256xi1>
    %c1_i32_2 = arith.constant 1 : i32
    %11 = vector.broadcast %c1_i32_2 : i32 to vector<8x256xi32>
    %12 = arith.cmpi sge, %3, %11 : vector<8x256xi32>
    %c1_i32_3 = arith.constant 1 : i32
    %13 = vector.broadcast %c1_i32_3 : i32 to vector<8x256xi32>
    %14 = arith.cmpi sge, %3, %13 : vector<8x256xi32>
    %c14_i32 = arith.constant 14 : i32
    %15 = vector.broadcast %c14_i32 : i32 to vector<8x256xi32>
    %16 = arith.cmpi sle, %5, %15 : vector<8x256xi32>
    %17 = arith.andi %14, %16 : vector<8x256xi1>
    %c1_i32_4 = arith.constant 1 : i32
    %18 = vector.broadcast %c1_i32_4 : i32 to vector<8x256xi32>
    %19 = arith.cmpi sge, %5, %18 : vector<8x256xi32>
    %c14_i32_5 = arith.constant 14 : i32
    %20 = vector.broadcast %c14_i32_5 : i32 to vector<8x256xi32>
    %21 = arith.cmpi sle, %5, %20 : vector<8x256xi32>
    %c14_i32_6 = arith.constant 14 : i32
    %22 = vector.broadcast %c14_i32_6 : i32 to vector<8x256xi32>
    %23 = arith.cmpi sle, %3, %22 : vector<8x256xi32>
    %c1_i32_7 = arith.constant 1 : i32
    %24 = vector.broadcast %c1_i32_7 : i32 to vector<8x256xi32>
    %25 = arith.cmpi sge, %5, %24 : vector<8x256xi32>
    %26 = arith.andi %23, %25 : vector<8x256xi1>
    %c14_i32_8 = arith.constant 14 : i32
    %27 = vector.broadcast %c14_i32_8 : i32 to vector<8x256xi32>
    %28 = arith.cmpi sle, %3, %27 : vector<8x256xi32>
    %c14_i32_9 = arith.constant 14 : i32
    %29 = vector.broadcast %c14_i32_9 : i32 to vector<8x256xi32>
    %30 = arith.cmpi sle, %3, %29 : vector<8x256xi32>
    %c14_i32_10 = arith.constant 14 : i32
    %31 = vector.broadcast %c14_i32_10 : i32 to vector<8x256xi32>
    %32 = arith.cmpi sle, %5, %31 : vector<8x256xi32>
    %33 = arith.andi %30, %32 : vector<8x256xi1>
    %c17_i32 = arith.constant 17 : i32
    %34 = tpu.dynamic_rotate %0 by %c17_i32 dim 1 : vector<8x256xf32>, i32 -> vector<8x256xf32>
    %cst = arith.constant 0.000000e+00 : f32
    %35 = vector.broadcast %cst : f32 to vector<8x256xf32>
    %36 = arith.select %10, %34, %35 : vector<8x256xi1>, vector<8x256xf32>
    %c16_i32 = arith.constant 16 : i32
    %37 = tpu.dynamic_rotate %0 by %c16_i32 dim 1 : vector<8x256xf32>, i32 -> vector<8x256xf32>
    %cst_11 = arith.constant 0.000000e+00 : f32
    %38 = vector.broadcast %cst_11 : f32 to vector<8x256xf32>
    %39 = arith.select %12, %37, %38 : vector<8x256xi1>, vector<8x256xf32>
    %c15_i32_12 = arith.constant 15 : i32
    %40 = tpu.dynamic_rotate %0 by %c15_i32_12 dim 1 : vector<8x256xf32>, i32 -> vector<8x256xf32>
    %cst_13 = arith.constant 0.000000e+00 : f32
    %41 = vector.broadcast %cst_13 : f32 to vector<8x256xf32>
    %42 = arith.select %17, %40, %41 : vector<8x256xi1>, vector<8x256xf32>
    %c1_i32_14 = arith.constant 1 : i32
    %43 = tpu.dynamic_rotate %0 by %c1_i32_14 dim 1 : vector<8x256xf32>, i32 -> vector<8x256xf32>
    %cst_15 = arith.constant 0.000000e+00 : f32
    %44 = vector.broadcast %cst_15 : f32 to vector<8x256xf32>
    %45 = arith.select %19, %43, %44 : vector<8x256xi1>, vector<8x256xf32>
    %c255_i32 = arith.constant 255 : i32
    %46 = tpu.dynamic_rotate %0 by %c255_i32 dim 1 : vector<8x256xf32>, i32 -> vector<8x256xf32>
    %cst_16 = arith.constant 0.000000e+00 : f32
    %47 = vector.broadcast %cst_16 : f32 to vector<8x256xf32>
    %48 = arith.select %21, %46, %47 : vector<8x256xi1>, vector<8x256xf32>
    %c241_i32 = arith.constant 241 : i32
    %49 = tpu.dynamic_rotate %0 by %c241_i32 dim 1 : vector<8x256xf32>, i32 -> vector<8x256xf32>
    %cst_17 = arith.constant 0.000000e+00 : f32
    %50 = vector.broadcast %cst_17 : f32 to vector<8x256xf32>
    %51 = arith.select %26, %49, %50 : vector<8x256xi1>, vector<8x256xf32>
    %c240_i32 = arith.constant 240 : i32
    %52 = tpu.dynamic_rotate %0 by %c240_i32 dim 1 : vector<8x256xf32>, i32 -> vector<8x256xf32>
    %cst_18 = arith.constant 0.000000e+00 : f32
    %53 = vector.broadcast %cst_18 : f32 to vector<8x256xf32>
    %54 = arith.select %28, %52, %53 : vector<8x256xi1>, vector<8x256xf32>
    %c239_i32 = arith.constant 239 : i32
    %55 = tpu.dynamic_rotate %0 by %c239_i32 dim 1 : vector<8x256xf32>, i32 -> vector<8x256xf32>
    %cst_19 = arith.constant 0.000000e+00 : f32
    %56 = vector.broadcast %cst_19 : f32 to vector<8x256xf32>
    %57 = arith.select %33, %55, %56 : vector<8x256xi1>, vector<8x256xf32>
    %58 = tpu.concatenate %36, %39, %42, %45, %0, %48, %51, %54, %57 in 0 : vector<8x256xf32>, vector<8x256xf32>, vector<8x256xf32>, vector<8x256xf32>, vector<8x256xf32>, vector<8x256xf32>, vector<8x256xf32>, vector<8x256xf32>, vector<8x256xf32> -> vector<72x256xf32>
    %c0_20 = arith.constant 0 : index
    %c0_21 = arith.constant 0 : index
    %59 = vector.load %arg1[%c0_20, %c0_21] : memref<8x72xf32, #tpu.memory_space<vmem>>, vector<8x72xf32>
    %cst_22 = arith.constant dense<0.000000e+00> : vector<8x256xf32>
    %60 = tpu.matmul %59, %58, %cst_22 {dimension_numbers = #tpu.dot_dimension_numbers<[1], [0], [0], [1], [0, 0, 1, 1], [], []>, precision = #tpu.contract_precision<fp32>} : vector<8x72xf32>, vector<72x256xf32>, vector<8x256xf32> -> vector<8x256xf32>
    %c0_23 = arith.constant 0 : index
    %c0_24 = arith.constant 0 : index
    %61 = vector.load %arg2[%c0_23, %c0_24] : memref<8x1xf32, #tpu.memory_space<vmem>>, vector<8x1xf32>
    %62 = vector.broadcast %61 : vector<8x1xf32> to vector<8x256xf32>
    %63 = arith.addf %60, %62 : vector<8x256xf32>
    %c0_25 = arith.constant 0 : index
    %c0_26 = arith.constant 0 : index
    %64 = vector.load %arg3[%c0_25, %c0_26] : memref<8x72xf32, #tpu.memory_space<vmem>>, vector<8x72xf32>
    %cst_27 = arith.constant dense<0.000000e+00> : vector<8x256xf32>
    %65 = tpu.matmul %64, %58, %cst_27 {dimension_numbers = #tpu.dot_dimension_numbers<[1], [0], [0], [1], [0, 0, 1, 1], [], []>, precision = #tpu.contract_precision<fp32>} : vector<8x72xf32>, vector<72x256xf32>, vector<8x256xf32> -> vector<8x256xf32>
    %c0_28 = arith.constant 0 : index
    %c0_29 = arith.constant 0 : index
    %66 = vector.load %arg4[%c0_28, %c0_29] : memref<8x1xf32, #tpu.memory_space<vmem>>, vector<8x1xf32>
    %67 = vector.broadcast %66 : vector<8x1xf32> to vector<8x256xf32>
    %68 = arith.addf %65, %67 : vector<8x256xf32>
    %69 = arith.negf %63 : vector<8x256xf32>
    %70 = math.exp %69 : vector<8x256xf32>
    %cst_30 = arith.constant 1.000000e+00 : f32
    %71 = vector.broadcast %cst_30 : f32 to vector<8x256xf32>
    %72 = arith.addf %71, %70 : vector<8x256xf32>
    %73 = arith.divf %71, %72 : vector<8x256xf32>
    %74 = math.tanh %68 : vector<8x256xf32>
    %75 = arith.mulf %73, %74 : vector<8x256xf32>
    %c17_i32_31 = arith.constant 17 : i32
    %76 = tpu.dynamic_rotate %75 by %c17_i32_31 dim 1 : vector<8x256xf32>, i32 -> vector<8x256xf32>
    %cst_32 = arith.constant 0.000000e+00 : f32
    %77 = vector.broadcast %cst_32 : f32 to vector<8x256xf32>
    %78 = arith.select %10, %76, %77 : vector<8x256xi1>, vector<8x256xf32>
    %c16_i32_33 = arith.constant 16 : i32
    %79 = tpu.dynamic_rotate %75 by %c16_i32_33 dim 1 : vector<8x256xf32>, i32 -> vector<8x256xf32>
    %cst_34 = arith.constant 0.000000e+00 : f32
    %80 = vector.broadcast %cst_34 : f32 to vector<8x256xf32>
    %81 = arith.select %12, %79, %80 : vector<8x256xi1>, vector<8x256xf32>
    %c15_i32_35 = arith.constant 15 : i32
    %82 = tpu.dynamic_rotate %75 by %c15_i32_35 dim 1 : vector<8x256xf32>, i32 -> vector<8x256xf32>
    %cst_36 = arith.constant 0.000000e+00 : f32
    %83 = vector.broadcast %cst_36 : f32 to vector<8x256xf32>
    %84 = arith.select %17, %82, %83 : vector<8x256xi1>, vector<8x256xf32>
    %c1_i32_37 = arith.constant 1 : i32
    %85 = tpu.dynamic_rotate %75 by %c1_i32_37 dim 1 : vector<8x256xf32>, i32 -> vector<8x256xf32>
    %cst_38 = arith.constant 0.000000e+00 : f32
    %86 = vector.broadcast %cst_38 : f32 to vector<8x256xf32>
    %87 = arith.select %19, %85, %86 : vector<8x256xi1>, vector<8x256xf32>
    %c255_i32_39 = arith.constant 255 : i32
    %88 = tpu.dynamic_rotate %75 by %c255_i32_39 dim 1 : vector<8x256xf32>, i32 -> vector<8x256xf32>
    %cst_40 = arith.constant 0.000000e+00 : f32
    %89 = vector.broadcast %cst_40 : f32 to vector<8x256xf32>
    %90 = arith.select %21, %88, %89 : vector<8x256xi1>, vector<8x256xf32>
    %c241_i32_41 = arith.constant 241 : i32
    %91 = tpu.dynamic_rotate %75 by %c241_i32_41 dim 1 : vector<8x256xf32>, i32 -> vector<8x256xf32>
    %cst_42 = arith.constant 0.000000e+00 : f32
    %92 = vector.broadcast %cst_42 : f32 to vector<8x256xf32>
    %93 = arith.select %26, %91, %92 : vector<8x256xi1>, vector<8x256xf32>
    %c240_i32_43 = arith.constant 240 : i32
    %94 = tpu.dynamic_rotate %75 by %c240_i32_43 dim 1 : vector<8x256xf32>, i32 -> vector<8x256xf32>
    %cst_44 = arith.constant 0.000000e+00 : f32
    %95 = vector.broadcast %cst_44 : f32 to vector<8x256xf32>
    %96 = arith.select %28, %94, %95 : vector<8x256xi1>, vector<8x256xf32>
    %c239_i32_45 = arith.constant 239 : i32
    %97 = tpu.dynamic_rotate %75 by %c239_i32_45 dim 1 : vector<8x256xf32>, i32 -> vector<8x256xf32>
    %cst_46 = arith.constant 0.000000e+00 : f32
    %98 = vector.broadcast %cst_46 : f32 to vector<8x256xf32>
    %99 = arith.select %33, %97, %98 : vector<8x256xi1>, vector<8x256xf32>
    %100 = tpu.concatenate %78, %81, %84, %87, %75, %90, %93, %96, %99 in 0 : vector<8x256xf32>, vector<8x256xf32>, vector<8x256xf32>, vector<8x256xf32>, vector<8x256xf32>, vector<8x256xf32>, vector<8x256xf32>, vector<8x256xf32>, vector<8x256xf32> -> vector<72x256xf32>
    %c0_47 = arith.constant 0 : index
    %c0_48 = arith.constant 0 : index
    %101 = vector.load %arg5[%c0_47, %c0_48] : memref<8x72xf32, #tpu.memory_space<vmem>>, vector<8x72xf32>
    %cst_49 = arith.constant dense<0.000000e+00> : vector<8x256xf32>
    %102 = tpu.matmul %101, %100, %cst_49 {dimension_numbers = #tpu.dot_dimension_numbers<[1], [0], [0], [1], [0, 0, 1, 1], [], []>, precision = #tpu.contract_precision<fp32>} : vector<8x72xf32>, vector<72x256xf32>, vector<8x256xf32> -> vector<8x256xf32>
    %c0_50 = arith.constant 0 : index
    %c0_51 = arith.constant 0 : index
    %103 = vector.load %arg6[%c0_50, %c0_51] : memref<8x1xf32, #tpu.memory_space<vmem>>, vector<8x1xf32>
    %104 = vector.broadcast %103 : vector<8x1xf32> to vector<8x256xf32>
    %105 = arith.addf %102, %104 : vector<8x256xf32>
    %cst_52 = arith.constant 0.000000e+00 : f32
    %106 = vector.broadcast %cst_52 : f32 to vector<8x256xf32>
    %107 = arith.maximumf %105, %106 : vector<8x256xf32>
    %108 = arith.addf %0, %107 : vector<8x256xf32>
    %c0_53 = arith.constant 0 : index
    %c0_54 = arith.constant 0 : index
    %109 = vector.load %arg7[%c0_53, %c0_54] : memref<8x256xf32, #tpu.memory_space<vmem>>, vector<8x256xf32>
    tpu.vector_store %arg7[%c0_53, %c0_54], %108 {strides = array<i32>} : memref<8x256xf32, #tpu.memory_space<vmem>>, vector<8x256xf32>,
    return
  }
}

</mosaic_0001>

<bundles_post_ra>
// kernel: tpu_custom_call.1
= control target key start
LH: loop header
LB: loop body
LE: loop exit
PB: predicated region body
PF: predicated region fallthrough
CT: control target
= control target key end

     0   :  { %12 = vsyncpa [#allocation3], 0  ;;  %s3512_s0 = inlined_call_operand.vmem [shape: f32[8,256], index: 0, kind: input, shape index: {}]   ;;  %s3513_s1 = inlined_call_operand.vmem [shape: f32[8,72], index: 1, kind: input, shape index: {}]   ;;  %s3514_s2 = inlined_call_operand.vmem [shape: f32[8,1], index: 2, kind: input, shape index: {}]   ;;  %s3515_s3 = inlined_call_operand.vmem [shape: f32[8,72], index: 3, kind: input, shape index: {}]   ;;  %s3516_s4 = inlined_call_operand.vmem [shape: f32[8,1], index: 4, kind: input, shape index: {}]   ;;  %s3517_s5 = inlined_call_operand.hbm [shape: f32[8,72], index: 5, kind: input, shape index: {}]   ;;  %s3518_s6 = inlined_call_operand.vmem [shape: f32[8,1], index: 6, kind: input, shape index: {}]   ;;  %s3519_s7 = inlined_call_operand.hbm [shape: f32[8,256], index: 7, kind: output, shape index: {}]  }
   0x1   :  { %13 = vsyncpa [#allocation4], 0  ;;  %s2361_s24 = smov [#allocation2]  }
   0x2   :  { %s30_s25 = sshll.u32 %s2361_s24, 4  ;;  %s31_s25 = int_to_ptr.vmem [resolvable:$true] %s30_s25 }
   0x3   :  { %s2325_s26 = scalar_lea.vmem %s31_s25, 128  ;;  %p2330_p1 = scmp.lt.s32.totalorder %s31_s25, %s31_s25 }
   0x4   :  { %p2326_p0 = scmp.ne.s32.totalorder %s31_s25, %s2325_s26  ;;  %p2331_p2 = scmp.lt.s32.totalorder %s2325_s26, %s2325_s26 }
   0x6   :  { %p2332_p3 = por %p2331_p2, %p2330_p1 }
   0x8   :  { %p2333_p4 = pnand %p2332_p3, %p2326_p0 }
   0xa   :  { %2336 = shalt.err (!%p2333_p4)
}
   0xb   :  { %33 = dma.hbm_to_vmem [thread:$0]  %s3517_s5, 128, %s31_s25, [#allocation3]  }
   0xc   :  { %2357 = dma.done.wait [#allocation3], 128  }
   0xd   :  { %2358 = vsyncadd [#allocation3], 4294967168  ;;  %v39_v0 = vld [vmem:[%s3512_s0] sm:$0xff]  ;;  %s2362_s8 = smov 112   ;;  %s2363_s9 = smov 111   ;;  %v40_v1 = vld [vmem:[%s3512_s0 + $0x8] sm:$0xff]  ;;  %v41_v3 = vlaneseq }
   0xe   :  { %118 = vrot.lane.b32.xlu1 %v39_v0, %s2362_s8  ;;  %127 = vrot.lane.b32.xlu0 %v39_v0, %s2363_s9  ;;  %s2364_s5 = smov 113   ;;  %s2365_s12 = smov 127   ;;  %v3527_v2 = vmov 0.0   ;;  %v2371_v5 = vmov 0   ;;  %v137_v6 = vld [vmem:[%s3514_s2] sm:$0xff]  ;;  %v2446_v8 = vand.u32 4294901760, %v40_v1 }
   0xf   :  { %s2366_s13 = smov 1   ;;  %s2367_s14 = smov 15   ;;  %229 = vmatprep.mubr.f32.mxu0 %v3527_v2  ;;  %395 = vmatprep.mubr.f32.mxu1 %v3527_v2  ;;  %v2440_v4 = vand.u32 127, %v41_v3  ;;  %v2450_v13 = vand.u32 4294901760, %v39_v0  ;;  %v3579_v15 = vmov 0  ;;  %v3582_v16 = vmov 0 }
  0x10   :  { %s2369_s15 = smov 16   ;;  %s2370_s16 = smov 17   ;;  %2301 = vset.pattern.permute.xlu0 %v2371_v5  ;;  %2302 = vset.pattern.permute.xlu1 %v2371_v5  ;;  %v2453_v14 = vsub.f32 %v40_v1, %v2446_v8  ;;  %v3585_v19 = vmov 0  ;;  %v3588_v20 = vmov 0  ;;  %v136_v23 = vld [vmem:[%s3513_s1] sm:$0xff]  ;;  %vm143_vm4 = vcmask 588800  }
  0x11   :  { %3578 = vst [vmem:[#allocation8_spill] sm:$0xff] %v2440_v4  ;;  %v43_v7 = vadd.s32 128, %v2440_v4  ;;  %v44_v9 = vshra.s32 %v2440_v4, 4  ;;  %v46_v10 = vand.u32 15, %v2440_v4  ;;  %v2475_v22 = vsub.f32 %v39_v0, %v2450_v13 }
  0x12   :  { %120 = vrot.lane.b32.xlu1 %v40_v1, %s2362_s8  ;;  %129 = vrot.lane.b32.xlu0 %v40_v1, %s2363_s9  ;;  %v2472_v21 = vand.u32 4294901760, %v2453_v14  ;;  %vm3520_vm5 = vcmp.lt.s32.totalorder %v2440_v4, 112  ;;  %vm131_vm7 = vcmp.lt.s32.totalorder %v2440_v4, 111  ;;  %v3591_v24 = vmov 0 }
  0x13   :  { %v45_v11 = vshra.s32 %v43_v7, 4  ;;  %v47_v12 = vand.u32 15, %v43_v7  ;;  %vm2455_vm0 = vcmp.le.s32.totalorder %v44_v9, 14  ;;  %vm2459_vm1 = vcmp.le.s32.totalorder %v46_v10, 14 }
  0x14   :  { %v3580_v15 = vsel %vm2455_vm0, 4294967295, %v3579_v15  ;;  %v3583_v16 = vsel %vm2459_vm1, 4294967295, %v3582_v16  ;;  %vm3522_vm6 = vmand %vm2455_vm0, %vm2459_vm1  ;;  %vm2490_vm9 = vcmp.ge.s32.totalorder %v46_v10, 1  ;;  %vm113_vm10 = vcmp.lt.s32.totalorder %v2440_v4, 113 }
  0x15   :  { %3581 = vst [vmem:[#allocation9_spill] sm:$0xff] %v3580_v15  ;;  %3584 = vst [vmem:[#allocation10_spill] sm:$0xff] %v3583_v16  ;;  %vm2463_vm2 = vcmp.le.s32.totalorder %v45_v11, 14  ;;  %vm2467_vm3 = vcmp.le.s32.totalorder %v47_v12, 14  ;;  %v3592_v24 = vsel %vm2490_vm9, 4294967295, %v3591_v24  ;;  %vm3523_vm11 = vcmp.lt.s32.totalorder %v2440_v4, 127 }
  0x16   :  { %111 = vrot.lane.b32.xlu1 %v40_v1, %s2364_s5  ;;  %109 = vrot.lane.b32.xlu0 %v39_v0, %s2364_s5  ;;  %v3586_v19 = vsel %vm2463_vm2, 4294967295, %v3585_v19  ;;  %v3589_v20 = vsel %vm2467_vm3, 4294967295, %v3588_v20  ;;  %vm3521_vm8 = vmand %vm2463_vm2, %vm2467_vm3  ;;  %3593 = vst [vmem:[#allocation13_spill] sm:$0xff] %v3592_v24  ;;  %vm2496_vm12 = vcmp.ge.s32.totalorder %v47_v12, 1  ;;  %v3594_v27 = vmov 0 }
  0x17   :  { %3587 = vst [vmem:[#allocation11_spill] sm:$0xff] %v3586_v19  ;;  %3590 = vst [vmem:[#allocation12_spill] sm:$0xff] %v3589_v20  ;;  %v3595_v27 = vsel %vm2496_vm12, 4294967295, %v3594_v27  ;;  %v306_v28 = vsub.f32 %v2453_v14, %v2472_v21  ;;  %v2503_v29 = vand.u32 4294901760, %v2475_v22  ;;  %v2506_v30 = vsel %vm143_vm4, %v136_v23, 0 }
  0x18   :  { %3596 = vst [vmem:[#allocation14_spill] sm:$0xff] %v3595_v27  ;;  %vm60_vm13 = vmand %vm2455_vm0, %vm2490_vm9  ;;  %vm3524_vm15 = vcmp.lt.s32.totalorder %v2440_v4, 1  ;;  %v3597_v45 = vmov 0  ;;  %v3600_v46 = vmov 0  ;;  %v2579_v55 = vand.u32 4294901760, %v2506_v30 }
  0x19   :  { %vm3525_vm14 = vmand %vm2463_vm2, %vm2496_vm12  ;;  %v312_v47 = vsub.f32 %v2475_v22, %v2503_v29  ;;  %v2576_v54 = vand.u32 4294901760, %v306_v28 }
  0x1a   :  { %102 = vrot.lane.b32.xlu1 %v40_v1, %s2365_s12  ;;  %100 = vrot.lane.b32.xlu0 %v39_v0, %s2365_s12 }
  0x1e   :  { %93 = vrot.lane.b32.xlu1 %v40_v1, %s2366_s13  ;;  %91 = vrot.lane.b32.xlu0 %v39_v0, %s2366_s13 }
  0x22   :  { %84 = vrot.lane.b32.xlu1 %v40_v1, %s2367_s14  ;;  %82 = vrot.lane.b32.xlu0 %v39_v0, %s2367_s14 }
  0x26   :  { %75 = vrot.lane.b32.xlu1 %v40_v1, %s2369_s15  ;;  %73 = vrot.lane.b32.xlu0 %v39_v0, %s2369_s15 }
  0x2a   :  { %66 = vrot.lane.b32.xlu1 %v40_v1, %s2370_s16  ;;  %64 = vrot.lane.b32.xlu0 %v39_v0, %s2370_s16 }
  0x2e   :  { %140 = vperm.xlu0 %2301, %v137_v6  }
  0x80   :  { %v119_v17 = vpop.permute.xlu1 %118  ;;  %v128_v18 = vpop.permute.xlu0 %127 }
  0x84   :  { %v121_v25 = vpop.permute.xlu1 %120  ;;  %v130_v26 = vpop.permute.xlu0 %129 }
  0x85   :  { %v123_v31 = vsel %vm3520_vm5, %v119_v17, %v121_v25  ;;  %v124_v32 = vsel %vm3520_vm5, %v121_v25, %v119_v17  ;;  %v132_v33 = vsel %vm131_vm7, %v128_v18, %v130_v26  ;;  %v133_v34 = vsel %vm131_vm7, %v130_v26, %v128_v18  ;;  %v821_v17 = vld [vmem:[%s3516_s4] sm:$0xff] }
  0x86   :  { %v125_v35 = vsel %vm2455_vm0, %v123_v31, 0.0  ;;  %v126_v36 = vsel %vm2463_vm2, %v124_v32, 0.0  ;;  %v134_v37 = vsel %vm3522_vm6, %v132_v33, 0.0  ;;  %v135_v38 = vsel %vm3521_vm8, %v133_v34, 0.0  ;;  %824 = vperm.xlu1 %2302, %v821_v17  }
  0x87   :  { %v2530_v39 = vand.u32 4294901760, %v126_v36  ;;  %v2532_v40 = vand.u32 4294901760, %v125_v35  ;;  %v2534_v41 = vand.u32 4294901760, %v135_v38  ;;  %v2536_v42 = vand.u32 4294901760, %v134_v37 }
  0x88   :  { %v112_v43 = vpop.permute.xlu1 %111  ;;  %v110_v44 = vpop.permute.xlu0 %109  ;;  %vm2547_vm5 = vcmp.ge.s32.totalorder %v44_v9, 1  ;;  %vm2551_vm8 = vcmp.ge.s32.totalorder %v45_v11, 1  ;;  %vm86_vm6 = vcmp.lt.s32.totalorder %v2440_v4, 15  ;;  %v2705_v17 = vsub.f32 %v2506_v30, %v2579_v55 }
  0x89   :  { %v3598_v45 = vsel %vm2547_vm5, 4294967295, %v3597_v45  ;;  %v3601_v46 = vsel %vm2551_vm8, 4294967295, %v3600_v46  ;;  %v2558_v48 = vsub.f32 %v126_v36, %v2530_v39  ;;  %v2561_v49 = vsub.f32 %v125_v35, %v2532_v40  ;;  %162 = vmatprep.subr.mxu0 %v2534_v41 }
  0x8a   :  { %3599 = vst [vmem:[#allocation15_spill] sm:$0xff] %v3598_v45  ;;  %3602 = vst [vmem:[#allocation16_spill] sm:$0xff] %v3601_v46  ;;  %v2564_v50 = vsub.f32 %v135_v38, %v2534_v41  ;;  %v2567_v51 = vsub.f32 %v134_v37, %v2536_v42  ;;  %v114_v52 = vsel %vm113_vm10, %v110_v44, %v112_v43  ;;  %164 = vmatpush1.msra.mxu0 %v2536_v42 }
  0x8b   :  { %v115_v53 = vsel %vm113_vm10, %v112_v43, %v110_v44  ;;  %v116_v56 = vsel %vm60_vm13, %v114_v52, 0.0  ;;  %166 = vmatprep.subr.mxu0 %v2530_v39  ;;  %v2604_v0 = vand.u32 4294901760, %v2558_v48  ;;  %v2607_v1 = vand.u32 4294901760, %v2561_v49 }
  0x8c   :  { %3603 = vst [vmem:[#allocation17_spill] sm:$0xff] %v2564_v50  ;;  %v117_v57 = vsel %vm3525_vm14, %v115_v53, 0.0  ;;  %v2593_v58 = vand.u32 4294901760, %v2564_v50  ;;  %v2596_v59 = vand.u32 4294901760, %v2567_v51  ;;  %v2600_v61 = vand.u32 4294901760, %v116_v56  ;;  %v103_v62 = vpop.permute.xlu1 %102  ;;  %168 = vmatpush1.msra.mxu0 %v2532_v40  ;;  %v101_v63 = vpop.permute.xlu0 %100  ;;  %vm3526_vm14 = vmand %vm2551_vm8, %vm2467_vm3 }
  0x8d   :  { %v2598_v60 = vand.u32 4294901760, %v117_v57  ;;  %v105_v3 = vsel %vm3523_vm11, %v101_v63, %v103_v62  ;;  %v106_v5 = vsel %vm3523_vm11, %v103_v62, %v101_v63  ;;  %vm3540_vm11 = vcmp.lt.s32.totalorder %v2440_v4, 16 }
  0x8e   :  { %v258_v6 = vsub.f32 %v2564_v50, %v2593_v58  ;;  %v264_v7 = vsub.f32 %v2567_v51, %v2596_v59  ;;  %v2621_v10 = vsub.f32 %v116_v56, %v2600_v61  ;;  %v107_v11 = vsel %vm2459_vm1, %v105_v3, 0.0 }
  0x8f   :  { %v2618_v9 = vsub.f32 %v117_v57, %v2598_v60  ;;  %v108_v12 = vsel %vm2467_vm3, %v106_v5, 0.0  ;;  %170 = vmatprep.subr.mxu0 %v2598_v60  ;;  %v2634_v23 = vand.u32 4294901760, %v107_v11  ;;  %v270_v32 = vsub.f32 %v2558_v48, %v2604_v0 }
  0x90   :  { %v2632_v18 = vand.u32 4294901760, %v108_v12  ;;  %172 = vmatpush1.msra.mxu0 %v2600_v61  ;;  %v2637_v25 = vand.u32 4294901760, %v258_v6  ;;  %v2639_v26 = vand.u32 4294901760, %v264_v7  ;;  %v94_v28 = vpop.permute.xlu1 %93  ;;  %v92_v31 = vpop.permute.xlu0 %91  ;;  %v276_v33 = vsub.f32 %v2561_v49, %v2607_v1 }
  0x91   :  { %v2646_v34 = vand.u32 4294901760, %v2618_v9  ;;  %v2649_v35 = vand.u32 4294901760, %v2621_v10  ;;  %v2655_v37 = vsub.f32 %v107_v11, %v2634_v23  ;;  %v96_v38 = vsel %vm3524_vm15, %v92_v31, %v94_v28 }
  0x92   :  { %3604 = vst [vmem:[#allocation18_spill] sm:$0xff] %v2637_v25  ;;  %3605 = vst [vmem:[#allocation19_spill] sm:$0xff] %v2639_v26  ;;  %v2652_v36 = vsub.f32 %v108_v12, %v2632_v18  ;;  %v97_v43 = vsel %vm3524_vm15, %v94_v28, %v92_v31  ;;  %174 = vmatprep.subr.mxu0 %v2632_v18  ;;  %v99_v52 = vsel %vm2496_vm12, %v96_v38, 0.0  ;;  %260 = vmatprep.subr.mxu1 %v2637_v25 }
  0x93   :  { %v98_v44 = vsel %vm2490_vm9, %v97_v43, 0.0  ;;  %176 = vmatpush1.msra.mxu0 %v2634_v23  ;;  %v2668_v53 = vand.u32 4294901760, %v270_v32  ;;  %v2670_v56 = vand.u32 4294901760, %v276_v33  ;;  %vm3538_vm15 = vmand %vm2547_vm5, %vm2459_vm1  ;;  %v2676_v57 = vand.u32 4294901760, %v99_v52  ;;  %266 = vmatpush1.msra.mxu1 %v2639_v26 }
  0x94   :  { %v2678_v62 = vand.u32 4294901760, %v98_v44  ;;  %178 = vmatprep.subr.mxu0 %v2446_v8  ;;  %v282_v63 = vsub.f32 %v2618_v9, %v2646_v34  ;;  %v288_v3 = vsub.f32 %v2621_v10, %v2649_v35  ;;  %v85_v5 = vpop.permute.xlu1 %84  ;;  %v83_v6 = vpop.permute.xlu0 %82  ;;  %v2693_v7 = vand.u32 4294901760, %v2652_v36 }
  0x95   :  { %3606 = vst [vmem:[#allocation20_spill] sm:$0xff] %v2668_v53  ;;  %3607 = vst [vmem:[#allocation21_spill] sm:$0xff] %v2670_v56  ;;  %272 = vmatprep.subr.mxu1 %v2668_v53  ;;  %180 = vmatpush1.msra.mxu0 %v2450_v13  ;;  %v2696_v11 = vand.u32 4294901760, %v2655_v37  ;;  %v2701_v12 = vand.u32 4294901760, %v312_v47  ;;  %v2708_v28 = vsub.f32 %v99_v52, %v2676_v57  ;;  %v3616_v53 = vand.u32 4294901760, %v2705_v17 }
  0x96   :  { %v2711_v31 = vsub.f32 %v98_v44, %v2678_v62  ;;  %278 = vmatpush1.msra.mxu1 %v2670_v56  ;;  %v87_v32 = vsel %vm86_vm6, %v83_v6, %v85_v5  ;;  %v88_v33 = vsel %vm86_vm6, %v85_v5, %v83_v6  ;;  %182 = vmatprep.subr.mxu0 %v2676_v57  ;;  %v2729_v38 = vand.u32 4294901760, %v282_v63 }
  0x97   :  { %3608 = vst [vmem:[#allocation22_spill] sm:$0xff] %v2701_v12  ;;  %v89_v30 = vsel %vm3538_vm15, %v88_v33, 0.0  ;;  %v90_v47 = vsel %vm3526_vm14, %v87_v32, 0.0  ;;  %v2731_v43 = vand.u32 4294901760, %v288_v3  ;;  %184 = vmatpush1.msra.mxu0 %v2678_v62  ;;  %v294_v5 = vsub.f32 %v2652_v36, %v2693_v7  ;;  %vm3572_vm15 = vmand %vm2547_vm5, %vm2490_vm9 }
  0x98   :  { %3609 = vst [vmem:[#allocation23_spill] sm:$0xff] %v2729_v38  ;;  %v2733_v44 = vand.u32 4294901760, %v90_v47  ;;  %v2735_v52 = vand.u32 4294901760, %v89_v30  ;;  %v300_v6 = vsub.f32 %v2655_v37, %v2696_v11  ;;  %284 = vmatprep.subr.mxu1 %v2729_v38  ;;  %v76_v32 = vpop.permute.xlu1 %75  ;;  %v74_v33 = vpop.permute.xlu0 %73  ;;  %vm68_vm14 = vcmp.lt.s32.totalorder %v2440_v4, 17 }
  0x99   :  { %3610 = vst [vmem:[#allocation24_spill] sm:$0xff] %v2731_v43  ;;  %v2745_v63 = vand.u32 4294901760, %v2708_v28  ;;  %v2748_v3 = vand.u32 4294901760, %v2711_v31  ;;  %290 = vmatpush1.msra.mxu1 %v2731_v43  ;;  %v78_v16 = vsel %vm3540_vm11, %v74_v33, %v76_v32  ;;  %v79_v15 = vsel %vm3540_vm11, %v76_v32, %v74_v33  ;;  %vm3571_vm11 = vmand %vm2551_vm8, %vm2496_vm12 }
  0x9a   :  { %v2752_v20 = vsub.f32 %v90_v47, %v2733_v44  ;;  %v2755_v19 = vsub.f32 %v89_v30, %v2735_v52  ;;  %v80_v38 = vsel %vm2547_vm5, %v79_v15, 0.0  ;;  %v81_v2 = vsel %vm2551_vm8, %v78_v16, 0.0  ;;  %186 = vmatprep.subr.mxu0 %v2733_v44 }
  0x9b   :  { %3611 = vst [vmem:[#allocation25_spill] sm:$0xff] %v2745_v63  ;;  %3612 = vst [vmem:[#allocation26_spill] sm:$0xff] %v2748_v3  ;;  %v2767_v47 = vand.u32 4294901760, %v294_v5  ;;  %v2769_v30 = vand.u32 4294901760, %v300_v6  ;;  %v2775_v43 = vand.u32 4294901760, %v81_v2  ;;  %v2777_v32 = vand.u32 4294901760, %v80_v38  ;;  %188 = vmatpush1.msra.mxu0 %v2735_v52 }
  0x9c   :  { %v318_v15 = vsub.f32 %v2708_v28, %v2745_v63  ;;  %v324_v16 = vsub.f32 %v2711_v31, %v2748_v3  ;;  %v67_v5 = vpop.permute.xlu1 %66  ;;  %v65_v6 = vpop.permute.xlu0 %64  ;;  %v2790_v33 = vand.u32 4294901760, %v2752_v20  ;;  %v2793_v56 = vand.u32 4294901760, %v2755_v19 }
  0x9d   :  { %3613 = vst [vmem:[#allocation27_spill] sm:$0xff] %v2767_v47  ;;  %296 = vmatprep.subr.mxu1 %v2767_v47  ;;  %v233_v26 = vsub.f32 %v2705_v17, %v3616_v53  ;;  %v2799_v25 = vsub.f32 %v81_v2, %v2775_v43  ;;  %v2802_v63 = vsub.f32 %v80_v38, %v2777_v32 }
  0x9e   :  { %3614 = vst [vmem:[#allocation28_spill] sm:$0xff] %v2790_v33  ;;  %3615 = vst [vmem:[#allocation29_spill] sm:$0xff] %v2793_v56  ;;  %302 = vmatpush1.msra.mxu1 %v2769_v30  ;;  %v69_v47 = vsel %vm68_vm14, %v65_v6, %v67_v5  ;;  %v70_v3 = vsel %vm68_vm14, %v67_v5, %v65_v6  ;;  %190 = vmatprep.subr.mxu0 %v2775_v43  ;;  %v2821_v38 = vand.u32 4294901760, %v318_v15 }
  0x9f   :  { %308 = vmatprep.subr.mxu1 %v2576_v54  ;;  %v71_v2 = vsel %vm3572_vm15, %v70_v3, 0.0  ;;  %v72_v53 = vsel %vm3571_vm11, %v69_v47, 0.0  ;;  %v2823_v4 = vand.u32 4294901760, %v324_v16  ;;  %192 = vmatpush1.msra.mxu0 %v2777_v32  ;;  %v330_v3 = vsub.f32 %v2752_v20, %v2790_v33  ;;  %vm3649_vm11 = vmand %vm2455_vm0, %vm2459_vm1 }
  0xa0   :  { %3617 = vst [vmem:[#allocation30_spill] sm:$0xff] %v2821_v38  ;;  %v2825_v5 = vand.u32 4294901760, %v72_v53  ;;  %v2827_v6 = vand.u32 4294901760, %v71_v2  ;;  %314 = vmatpush1.msra.mxu1 %v2701_v12  ;;  %v336_v47 = vsub.f32 %v2755_v19, %v2793_v56  ;;  %v234_v15 = vand.u32 4294901760, %v233_v26  ;;  %vm3652_vm15 = vmand %vm2463_vm2, %vm2467_vm3 }
  0xa1   :  { %3618 = vst [vmem:[#allocation31_spill] sm:$0xff] %v2823_v4  ;;  %320 = vmatprep.subr.mxu1 %v2821_v38  ;;  %v2837_v16 = vand.u32 4294901760, %v2799_v25  ;;  %v2840_v46 = vand.u32 4294901760, %v2802_v63  ;;  %v2850_v24 = vand.u32 4294901760, %v330_v3  ;;  %v3624_v12 = vmov 0.0  }
  0xa2   :  { %v2843_v45 = vsub.f32 %v72_v53, %v2825_v5  ;;  %v2846_v27 = vsub.f32 %v71_v2, %v2827_v6  ;;  %326 = vmatpush1.msra.mxu1 %v2823_v4  ;;  %194 = vmatprep.subr.mxu0 %v2825_v5  ;;  %v2852_v38 = vand.u32 4294901760, %v336_v47 }
  0xa3   :  { %3619 = vst [vmem:[#allocation32_spill] sm:$0xff] %v2837_v16  ;;  %3620 = vst [vmem:[#allocation33_spill] sm:$0xff] %v2840_v46  ;;  %196 = vmatpush1.msra.mxu0 %v2827_v6  ;;  %v342_v26 = vsub.f32 %v2799_v25, %v2837_v16  ;;  %v348_v53 = vsub.f32 %v2802_v63, %v2840_v46  ;;  %332 = vmatprep.subr.mxu1 %v2850_v24 }
  0xa4   :  { %3621 = vst [vmem:[#allocation34_spill] sm:$0xff] %v2850_v24  ;;  %419 = vmatprep.subr.mxu0 %v2564_v50  ;;  %v2862_v2 = vand.u32 4294901760, %v2843_v45  ;;  %v2865_v3 = vand.u32 4294901760, %v2846_v27  ;;  %338 = vmatpush1.msra.mxu1 %v2852_v38 }
  0xa5   :  { %235 = vmatmul.mubr.f32.vlgmr.msra.gmra.mxu0 %v234_v15  ;;  %v2868_v47 = vand.u32 4294901760, %v342_v26  ;;  %v2870_v4 = vand.u32 4294901760, %v348_v53  ;;  %v3627_v53 = vld [vmem:[#allocation26_spill] sm:$0xff] }
  0xa6   :  { %3622 = vst [vmem:[#allocation35_spill] sm:$0xff] %v2862_v2  ;;  %3623 = vst [vmem:[#allocation36_spill] sm:$0xff] %v2865_v3  ;;  %422 = vmatpush1.msra.mxu0 %v2567_v51  ;;  %v354_v24 = vsub.f32 %v2843_v45, %v2862_v2  ;;  %v360_v50 = vsub.f32 %v2846_v27, %v2865_v3  ;;  %503 = vmatprep.mubr.f32.mxu0 %v3624_v12 }
  0xa7   :  { %344 = vmatprep.subr.mxu1 %v2868_v47  ;;  %425 = vmatprep.subr.mxu0 %v2558_v48 }
  0xa8   :  { %350 = vmatpush1.msra.mxu1 %v2870_v4  ;;  %428 = vmatpush1.msra.mxu0 %v2561_v49  ;;  %v2882_v15 = vand.u32 4294901760, %v354_v24  ;;  %v2884_v26 = vand.u32 4294901760, %v360_v50  ;;  %v3625_v24 = vand.u32 4294901760, %v2705_v17  ;;  %v3626_v50 = vld [vmem:[#allocation25_spill] sm:$0xff] }
  0xa9   :  { %431 = vmatprep.subr.mxu0 %v2618_v9 }
  0xaa   :  { %434 = vmatpush1.msra.mxu0 %v2621_v10  ;;  %356 = vmatprep.subr.mxu1 %v2882_v15 }
  0xab   :  { %437 = vmatprep.subr.mxu0 %v2652_v36  ;;  %362 = vmatpush1.msra.mxu1 %v2884_v26 }
  0xac   :  { %440 = vmatpush1.msra.mxu0 %v2655_v37  ;;  %397 = vmatmul.mubr.f32.vlgmr.msra.gmra.mxu1 %v2579_v55 }
  0xad   :  { %443 = vmatprep.subr.mxu0 %v2453_v14  ;;  %527 = vmatprep.subr.mxu1 %v2534_v41 }
  0xae   :  { %446 = vmatpush1.msra.mxu0 %v2475_v22  ;;  %529 = vmatpush1.msra.mxu1 %v2536_v42 }
  0xaf   :  { %449 = vmatprep.subr.mxu0 %v2708_v28  ;;  %531 = vmatprep.subr.mxu1 %v2530_v39 }
  0xb0   :  { %452 = vmatpush1.msra.mxu0 %v2711_v31  ;;  %533 = vmatpush1.msra.mxu1 %v2532_v40 }
  0xb1   :  { %455 = vmatprep.subr.mxu0 %v2752_v20  ;;  %535 = vmatprep.subr.mxu1 %v2598_v60 }
  0xb2   :  { %458 = vmatpush1.msra.mxu0 %v2755_v19  ;;  %537 = vmatpush1.msra.mxu1 %v2600_v61 }
  0xb3   :  { %461 = vmatprep.subr.mxu0 %v2799_v25  ;;  %539 = vmatprep.subr.mxu1 %v2632_v18 }
  0xb4   :  { %464 = vmatpush1.msra.mxu0 %v2802_v63  ;;  %541 = vmatpush1.msra.mxu1 %v2634_v23 }
  0xb5   :  { %467 = vmatprep.subr.mxu0 %v2843_v45  ;;  %543 = vmatprep.subr.mxu1 %v2446_v8 }
  0xb6   :  { %470 = vmatpush1.msra.mxu0 %v2846_v27  ;;  %545 = vmatpush1.msra.mxu1 %v2450_v13 }
  0xb7   :  { %506 = vmatmul.mubr.f32.vlgmr.msra.gmra.mxu0 %v2705_v17  ;;  %547 = vmatprep.subr.mxu1 %v2676_v57  ;;  %v820_v17 = vld [vmem:[%s3515_s3] sm:$0xff] }
  0xb8   :  { %621 = vmatprep.subr.mxu0 %v2593_v58  ;;  %549 = vmatpush1.msra.mxu1 %v2678_v62 }
  0xb9   :  { %625 = vmatpush1.msra.mxu0 %v2596_v59  ;;  %551 = vmatprep.subr.mxu1 %v2733_v44 }
  0xba   :  { %629 = vmatprep.subr.mxu0 %v2604_v0  ;;  %553 = vmatpush1.msra.mxu1 %v2735_v52 }
  0xbb   :  { %633 = vmatpush1.msra.mxu0 %v2607_v1  ;;  %555 = vmatprep.subr.mxu1 %v2775_v43 }
  0xbc   :  { %637 = vmatprep.subr.mxu0 %v2646_v34  ;;  %557 = vmatpush1.msra.mxu1 %v2777_v32 }
  0xbd   :  { %641 = vmatpush1.msra.mxu0 %v2649_v35  ;;  %559 = vmatprep.subr.mxu1 %v2825_v5 }
  0xbe   :  { %645 = vmatprep.subr.mxu0 %v2693_v7  ;;  %561 = vmatpush1.msra.mxu1 %v2827_v6 }
  0xbf   :  { %594 = vmatprep.mubr.f32.mxu1 %v3624_v12  ;;  %649 = vmatpush1.msra.mxu0 %v2696_v11 }
  0xc0   :  { %598 = vmatmul.mubr.f32.vlgmr.msra.gmra.mxu1 %v3625_v24  ;;  %653 = vmatprep.subr.mxu0 %v2472_v21  ;;  %v828_v24 = vsel %vm143_vm4, %v820_v17, 0 }
  0xc1   :  { %745 = vmatprep.subr.mxu1 %v2534_v41  ;;  %657 = vmatpush1.msra.mxu0 %v2503_v29 }
  0xc2   :  { %747 = vmatpush1.msra.mxu1 %v2536_v42  ;;  %661 = vmatprep.subr.mxu0 %v3626_v50 }
  0xc3   :  { %749 = vmatprep.subr.mxu1 %v2530_v39  ;;  %665 = vmatpush1.msra.mxu0 %v3627_v53 }
  0xc4   :  { %751 = vmatpush1.msra.mxu1 %v2532_v40  ;;  %669 = vmatprep.subr.mxu0 %v2790_v33  ;;  %v3632_v33 = vld [vmem:[#allocation23_spill] sm:$0xff] }
  0xc5   :  { %753 = vmatprep.subr.mxu1 %v2598_v60  ;;  %673 = vmatpush1.msra.mxu0 %v2793_v56  ;;  %v3631_v56 = vld [vmem:[#allocation21_spill] sm:$0xff] }
  0xc6   :  { %755 = vmatpush1.msra.mxu1 %v2600_v61  ;;  %677 = vmatprep.subr.mxu0 %v2837_v16  ;;  %v3630_v16 = vld [vmem:[#allocation20_spill] sm:$0xff] }
  0xc7   :  { %757 = vmatprep.subr.mxu1 %v2632_v18  ;;  %681 = vmatpush1.msra.mxu0 %v2840_v46  ;;  %v2962_v46 = vand.u32 4294901760, %v828_v24 }
  0xc8   :  { %759 = vmatpush1.msra.mxu1 %v2634_v23  ;;  %685 = vmatprep.subr.mxu0 %v2862_v2  ;;  %v3629_v2 = vld [vmem:[#allocation19_spill] sm:$0xff] }
  0xc9   :  { %761 = vmatprep.subr.mxu1 %v2446_v8  ;;  %689 = vmatpush1.msra.mxu0 %v2865_v3  ;;  %v2973_v17 = vsub.f32 %v828_v24, %v2962_v46  ;;  %v3628_v24 = vld [vmem:[#allocation18_spill] sm:$0xff] }
  0xca   :  { %722 = vmatprep.mubr.f32.mxu0 %v3624_v12  ;;  %763 = vmatpush1.msra.mxu1 %v2450_v13 }
  0xcb   :  { %724 = vmatmul.mubr.f32.vlgmr.msra.gmra.mxu0 %v2579_v55  ;;  %765 = vmatprep.subr.mxu1 %v2676_v57  ;;  %v915_v3 = vand.u32 4294901760, %v2973_v17 }
  0xcc   :  { %845 = vmatprep.subr.mxu0 %v2534_v41  ;;  %767 = vmatpush1.msra.mxu1 %v2678_v62 }
  0xcd   :  { %847 = vmatpush1.msra.mxu0 %v2536_v42  ;;  %769 = vmatprep.subr.mxu1 %v2733_v44 }
  0xce   :  { %849 = vmatprep.subr.mxu0 %v2530_v39  ;;  %771 = vmatpush1.msra.mxu1 %v2735_v52 }
  0xcf   :  { %851 = vmatpush1.msra.mxu0 %v2532_v40  ;;  %773 = vmatprep.subr.mxu1 %v2775_v43 }
  0xd0   :  { %853 = vmatprep.subr.mxu0 %v2598_v60  ;;  %775 = vmatpush1.msra.mxu1 %v2777_v32 }
  0xd1   :  { %855 = vmatpush1.msra.mxu0 %v2600_v61  ;;  %777 = vmatprep.subr.mxu1 %v2825_v5 }
  0xd2   :  { %857 = vmatprep.subr.mxu0 %v2632_v18  ;;  %779 = vmatpush1.msra.mxu1 %v2827_v6 }
  0xd3   :  { %812 = vmatprep.mubr.f32.mxu1 %v3624_v12  ;;  %859 = vmatpush1.msra.mxu0 %v2634_v23 }
  0xd4   :  { %814 = vmatmul.mubr.f32.vlgmr.msra.gmra.mxu1 %v2579_v55  ;;  %861 = vmatprep.subr.mxu0 %v2446_v8  ;;  %v916_v55 = vsub.f32 %v2973_v17, %v915_v3 }
  0xd5   :  { %943 = vmatprep.subr.mxu1 %v3628_v24  ;;  %863 = vmatpush1.msra.mxu0 %v2450_v13  ;;  %v3633_v24 = vld [vmem:[#allocation24_spill] sm:$0xff] }
  0xd6   :  { %949 = vmatpush1.msra.mxu1 %v3629_v2  ;;  %865 = vmatprep.subr.mxu0 %v2676_v57  ;;  %v3634_v2 = vld [vmem:[#allocation27_spill] sm:$0xff] }
  0xd7   :  { %955 = vmatprep.subr.mxu1 %v3630_v16  ;;  %867 = vmatpush1.msra.mxu0 %v2678_v62  ;;  %v3636_v16 = vld [vmem:[#allocation30_spill] sm:$0xff] }
  0xd8   :  { %961 = vmatpush1.msra.mxu1 %v3631_v56  ;;  %869 = vmatprep.subr.mxu0 %v2733_v44  ;;  %v917_v56 = vand.u32 4294901760, %v916_v55 }
  0xd9   :  { %967 = vmatprep.subr.mxu1 %v3632_v33  ;;  %871 = vmatpush1.msra.mxu0 %v2735_v52  ;;  %v3635_v33 = vld [vmem:[#allocation22_spill] sm:$0xff] }
  0xda   :  { %973 = vmatpush1.msra.mxu1 %v3633_v24  ;;  %873 = vmatprep.subr.mxu0 %v2775_v43  ;;  %v3637_v24 = vld [vmem:[#allocation17_spill] sm:$0xff] }
  0xdb   :  { %979 = vmatprep.subr.mxu1 %v3634_v2  ;;  %875 = vmatpush1.msra.mxu0 %v2777_v32  ;;  %v3638_v2 = vld [vmem:[#allocation31_spill] sm:$0xff] }
  0xdc   :  { %985 = vmatpush1.msra.mxu1 %v2769_v30  ;;  %877 = vmatprep.subr.mxu0 %v2825_v5  ;;  %v3639_v30 = vld [vmem:[#allocation34_spill] sm:$0xff] }
  0xdd   :  { %991 = vmatprep.subr.mxu1 %v2576_v54  ;;  %879 = vmatpush1.msra.mxu0 %v2827_v6 }
  0xde   :  { %997 = vmatpush1.msra.mxu1 %v3635_v33  ;;  %912 = vmatprep.mubr.f32.mxu0 %v3624_v12 }
  0xdf   :  { %1003 = vmatprep.subr.mxu1 %v3636_v16  ;;  %1102 = vmatprep.subr.mxu0 %v3637_v24 }
  0xe0   :  { %918 = vmatmul.mubr.f32.vlgmr.msra.gmra.mxu0 %v917_v56  ;;  %1009 = vmatpush1.msra.mxu1 %v3638_v2 }
  0xe1   :  { %1105 = vmatpush1.msra.mxu0 %v2567_v51  ;;  %1015 = vmatprep.subr.mxu1 %v3639_v30 }
  0xe2   :  { %1108 = vmatprep.subr.mxu0 %v2558_v48  ;;  %1021 = vmatpush1.msra.mxu1 %v2852_v38 }
  0xe3   :  { %1111 = vmatpush1.msra.mxu0 %v2561_v49  ;;  %1027 = vmatprep.subr.mxu1 %v2868_v47 }
  0xe4   :  { %1114 = vmatprep.subr.mxu0 %v2618_v9  ;;  %1033 = vmatpush1.msra.mxu1 %v2870_v4  ;;  %v3640_v4 = vld [vmem:[#allocation28_spill] sm:$0xff] }
  0xe5   :  { %1117 = vmatpush1.msra.mxu0 %v2621_v10  ;;  %1039 = vmatprep.subr.mxu1 %v2882_v15 }
  0xe6   :  { %1120 = vmatprep.subr.mxu0 %v2652_v36  ;;  %1045 = vmatpush1.msra.mxu1 %v2884_v26 }
  0xe7   :  { %1078 = vmatprep.mubr.f32.mxu1 %v3624_v12  ;;  %1123 = vmatpush1.msra.mxu0 %v2655_v37 }
  0xe8   :  { %1080 = vmatmul.mubr.f32.vlgmr.msra.gmra.mxu1 %v2962_v46  ;;  %1126 = vmatprep.subr.mxu0 %v2453_v14  ;;  %v3641_v14 = vld [vmem:[#allocation29_spill] sm:$0xff] }
  0xe9   :  { %1210 = vmatprep.subr.mxu1 %v2534_v41  ;;  %1129 = vmatpush1.msra.mxu0 %v2475_v22  ;;  %v3645_v22 = vld [vmem:[#allocation36_spill] sm:$0xff] }
  0xea   :  { %1212 = vmatpush1.msra.mxu1 %v2536_v42  ;;  %1132 = vmatprep.subr.mxu0 %v2708_v28 }
  0xeb   :  { %1214 = vmatprep.subr.mxu1 %v2530_v39  ;;  %1135 = vmatpush1.msra.mxu0 %v2711_v31 }
  0xec   :  { %1216 = vmatpush1.msra.mxu1 %v2532_v40  ;;  %1138 = vmatprep.subr.mxu0 %v2752_v20  ;;  %v3643_v20 = vld [vmem:[#allocation33_spill] sm:$0xff] }
  0xed   :  { %1218 = vmatprep.subr.mxu1 %v2598_v60  ;;  %1141 = vmatpush1.msra.mxu0 %v2755_v19  ;;  %v3642_v19 = vld [vmem:[#allocation32_spill] sm:$0xff] }
  0xee   :  { %1220 = vmatpush1.msra.mxu1 %v2600_v61  ;;  %1144 = vmatprep.subr.mxu0 %v2799_v25 }
  0xef   :  { %1222 = vmatprep.subr.mxu1 %v2632_v18  ;;  %1147 = vmatpush1.msra.mxu0 %v2802_v63 }
  0xf0   :  { %1224 = vmatpush1.msra.mxu1 %v2634_v23  ;;  %1150 = vmatprep.subr.mxu0 %v2843_v45 }
  0xf1   :  { %1226 = vmatprep.subr.mxu1 %v2446_v8  ;;  %1153 = vmatpush1.msra.mxu0 %v2846_v27  ;;  %v141_v27 = vpop.permute.xlu0 %140 }
  0xf2   :  { %1186 = vmatprep.mubr.f32.mxu0 %v3624_v12  ;;  %1228 = vmatpush1.msra.mxu1 %v2450_v13 }
  0xf3   :  { %1189 = vmatmul.mubr.f32.vlgmr.msra.gmra.mxu0 %v2973_v17  ;;  %1230 = vmatprep.subr.mxu1 %v2676_v57 }
  0xf4   :  { %1304 = vmatprep.subr.mxu0 %v2593_v58  ;;  %1232 = vmatpush1.msra.mxu1 %v2678_v62 }
  0xf5   :  { %1308 = vmatpush1.msra.mxu0 %v2596_v59  ;;  %1234 = vmatprep.subr.mxu1 %v2733_v44 }
  0xf6   :  { %1312 = vmatprep.subr.mxu0 %v2604_v0  ;;  %1236 = vmatpush1.msra.mxu1 %v2735_v52 }
  0xf7   :  { %1316 = vmatpush1.msra.mxu0 %v2607_v1  ;;  %1238 = vmatprep.subr.mxu1 %v2775_v43 }
  0xf8   :  { %1320 = vmatprep.subr.mxu0 %v2646_v34  ;;  %1240 = vmatpush1.msra.mxu1 %v2777_v32 }
  0xf9   :  { %1324 = vmatpush1.msra.mxu0 %v2649_v35  ;;  %1242 = vmatprep.subr.mxu1 %v2825_v5 }
  0xfa   :  { %1328 = vmatprep.subr.mxu0 %v2693_v7  ;;  %1244 = vmatpush1.msra.mxu1 %v2827_v6 }
  0xfb   :  { %1277 = vmatprep.mubr.f32.mxu1 %v3624_v12  ;;  %1332 = vmatpush1.msra.mxu0 %v2696_v11 }
  0xfc   :  { %1281 = vmatmul.mubr.f32.vlgmr.msra.gmra.mxu1 %v915_v3  ;;  %1336 = vmatprep.subr.mxu0 %v2472_v21  ;;  %v3644_v21 = vld [vmem:[#allocation35_spill] sm:$0xff] }
  0xfd   :  { %1428 = vmatprep.subr.mxu1 %v2534_v41  ;;  %1340 = vmatpush1.msra.mxu0 %v2503_v29 }
  0xfe   :  { %1430 = vmatpush1.msra.mxu1 %v2536_v42  ;;  %1344 = vmatprep.subr.mxu0 %v3626_v50 }
  0xff   :  { %1432 = vmatprep.subr.mxu1 %v2530_v39  ;;  %1348 = vmatpush1.msra.mxu0 %v3627_v53 }
 0x100   :  { %1434 = vmatpush1.msra.mxu1 %v2532_v40  ;;  %1352 = vmatprep.subr.mxu0 %v3640_v4 }
 0x101   :  { %1436 = vmatprep.subr.mxu1 %v2598_v60  ;;  %1356 = vmatpush1.msra.mxu0 %v3641_v14  ;;  %v825_v37 = vpop.permute.xlu1 %824 }
 0x102   :  { %1438 = vmatpush1.msra.mxu1 %v2600_v61  ;;  %1360 = vmatprep.subr.mxu0 %v3642_v19 }
 0x103   :  { %1440 = vmatprep.subr.mxu1 %v2632_v18  ;;  %1364 = vmatpush1.msra.mxu0 %v3643_v20 }
 0x104   :  { %1442 = vmatpush1.msra.mxu1 %v2634_v23  ;;  %1368 = vmatprep.subr.mxu0 %v3644_v21 }
 0x105   :  { %1444 = vmatprep.subr.mxu1 %v2446_v8  ;;  %1372 = vmatpush1.msra.mxu0 %v3645_v22  ;;  %v1584_v22 = vld [vmem:[%s3518_s6] sm:$0xff]  ;;  %s2372_s6 = smov [#allocation5]  }
 0x106   :  { %1405 = vmatprep.mubr.f32.mxu0 %v3624_v12  ;;  %1446 = vmatpush1.msra.mxu1 %v2450_v13  ;;  %s2278_s23 = sshll.u32 %s2372_s6, 4  ;;  %s2279_s23 = int_to_ptr.vmem [resolvable:$true] %s2278_s23 }
 0x107   :  { %1407 = vmatmul.mubr.f32.vlgmr.msra.gmra.mxu0 %v2962_v46  ;;  %1448 = vmatprep.subr.mxu1 %v2676_v57  ;;  %s2337_s28 = scalar_lea.vmem %s2279_s23, 256  ;;  %p2342_p6 = scmp.lt.s32.totalorder %s2279_s23, %s2279_s23 }
 0x108   :  { %1450 = vmatpush1.msra.mxu1 %v2678_v62  ;;  %1495 = vmatprep.mubr.f32.mxu1 %v3624_v12  ;;  %p2338_p5 = scmp.ne.s32.totalorder %s2279_s23, %s2337_s28  ;;  %p2343_p7 = scmp.lt.s32.totalorder %s2337_s28, %s2337_s28 }
 0x109   :  { %1452 = vmatprep.subr.mxu1 %v2733_v44  ;;  %1675 = vmatprep.mubr.f32.mxu0 %v3624_v12 }
 0x10a   :  { %1454 = vmatpush1.msra.mxu1 %v2735_v52  ;;  %p2344_p8 = por %p2343_p7, %p2342_p6 }
 0x10b   :  { %1456 = vmatprep.subr.mxu1 %v2775_v43 }
 0x10c   :  { %1458 = vmatpush1.msra.mxu1 %v2777_v32  ;;  %p2345_p9 = pnand %p2344_p8, %p2338_p5 }
 0x10d   :  { %1460 = vmatprep.subr.mxu1 %v2825_v5 }
 0x10e   :  { %1462 = vmatpush1.msra.mxu1 %v2827_v6 }
 0x10f   :  { %1497 = vmatmul.mubr.f32.vlgmr.msra.gmra.mxu1 %v2962_v46 }
 0x110   :  { %1841 = vmatprep.mubr.f32.mxu1 %v3624_v12 }
 0x165   :  { %v236_v8 = vpop.f32.mrf.mxu0 }
 0x166   :  { %v237_v41 = vadd.f32 %v236_v8, %v141_v27 }
 0x167   :  { %v238_v29 = vpop.f32.mrf.mxu0 }
 0x168   :  { %v239_v45 = vadd.f32 %v238_v29, %v141_v27 }
 0x16c   :  { %v398_v13 = vpop.f32.mrf.mxu1 }
 0x16d   :  { %v399_v49 = vadd.f32 %v398_v13, %v237_v41 }
 0x16e   :  { %v400_v39 = vpop.f32.mrf.mxu1 }
 0x16f   :  { %v401_v58 = vadd.f32 %v400_v39, %v239_v45  ;;  %v3646_v39 = vld [vmem:[#allocation8_spill] sm:$0xff] }
 0x177   :  { %v507_v40 = vpop.f32.mrf.mxu0 }
 0x178   :  { %v508_v59 = vadd.f32 %v507_v40, %v399_v49 }
 0x179   :  { %v509_v48 = vpop.f32.mrf.mxu0 }
 0x17a   :  { %v510_v61 = vadd.f32 %v509_v48, %v401_v58 }
 0x180   :  { %v599_v42 = vpop.f32.mrf.mxu1 }
 0x181   :  { %v600_v46 = vadd.f32 %v599_v42, %v508_v59 }
 0x182   :  { %v601_v51 = vpop.f32.mrf.mxu1 }
 0x183   :  { %v602_v1 = vadd.f32 %v601_v51, %v510_v61 }
 0x18b   :  { %v725_v54 = vpop.f32.mrf.mxu0 }
 0x18c   :  { %v726_v9 = vadd.f32 %v725_v54, %v600_v46 }
 0x18d   :  { %v727_v0 = vpop.f32.mrf.mxu0 }
 0x18e   :  { %v728_v18 = vadd.f32 %v727_v0, %v602_v1 }
 0x194   :  { %v815_v60 = vpop.f32.mrf.mxu1 }
 0x195   :  { %v816_v23 = vadd.f32 %v815_v60, %v726_v9 }
 0x196   :  { %v817_v10 = vpop.f32.mrf.mxu1 }
 0x197   :  { %v818_v25 = vadd.f32 %v817_v10, %v728_v18  ;;  %v2287_v34 = vmul.f32 -1.442695, %v816_v23  ;;  %v1583_v23 = vld [vmem:[#allocation2] sm:$0xff] }
 0x199   :  { %v2288_v35 = vmul.f32 -1.442695, %v818_v25  ;;  %2303 = vpow2.f32 %v2287_v34 }
 0x19b   :  { %2305 = vpow2.f32 %v2288_v35 }
 0x1a0   :  { %v919_v36 = vpop.f32.mrf.mxu0 }
 0x1a1   :  { %v920_v11 = vadd.f32 %v919_v36, %v825_v37 }
 0x1a2   :  { %v921_v57 = vpop.f32.mrf.mxu0 }
 0x1a3   :  { %v922_v31 = vadd.f32 %v921_v57, %v825_v37 }
 0x1a6   :  { %v2304_v32 = vpop.eup %2303 }
 0x1a7   :  { %v1509_v26 = vadd.f32 1.0, %v2304_v32 }
 0x1a8   :  { %v1081_v62 = vpop.f32.mrf.mxu1  ;;  %v2306_v3 = vpop.eup %2305 }
 0x1a9   :  { %v1082_v52 = vadd.f32 %v1081_v62, %v920_v11  ;;  %v1510_v55 = vadd.f32 1.0, %v2306_v3  ;;  %2307 = vrcp.f32 %v1509_v26 }
 0x1aa   :  { %v1083_v28 = vpop.f32.mrf.mxu1 }
 0x1ab   :  { %v1084_v38 = vadd.f32 %v1083_v28, %v922_v31  ;;  %v1591_v31 = vsel %vm143_vm4, %v1583_v23, 0  ;;  %vm3657_vm4 = vmand %vm2463_vm2, %vm2496_vm12 }
 0x1b3   :  { %v1190_v7 = vpop.f32.mrf.mxu0 }
 0x1b4   :  { %v1191_v5 = vadd.f32 %v1190_v7, %v1082_v52 }
 0x1b5   :  { %v1192_v43 = vpop.f32.mrf.mxu0 }
 0x1b6   :  { %v1193_v47 = vadd.f32 %v1192_v43, %v1084_v38  ;;  %v2308_v30 = vpop.eup %2307 }
 0x1bc   :  { %v1282_v44 = vpop.f32.mrf.mxu1 }
 0x1bd   :  { %v1283_v15 = vadd.f32 %v1282_v44, %v1191_v5 }
 0x1be   :  { %v1284_v6 = vpop.f32.mrf.mxu1 }
 0x1bf   :  { %v1285_v53 = vadd.f32 %v1284_v6, %v1193_v47 }
 0x1c7   :  { %v1408_v63 = vpop.f32.mrf.mxu0 }
 0x1c8   :  { %v1409_v17 = vadd.f32 %v1408_v63, %v1283_v15 }
 0x1c9   :  { %v1410_v50 = vpop.f32.mrf.mxu0 }
 0x1ca   :  { %v1411_v33 = vadd.f32 %v1410_v50, %v1285_v53 }
 0x1cf   :  { %v1498_v56 = vpop.f32.mrf.mxu1 }
 0x1d0   :  { %v1499_v16 = vadd.f32 %v1498_v56, %v1409_v17 }
 0x1d1   :  { %v1500_v24 = vpop.f32.mrf.mxu1 }
 0x1d2   :  { %2309 = vtanh.f32 %v1499_v16  ;;  %v1501_v2 = vadd.f32 %v1500_v24, %v1411_v33  ;;  %v3211_v24 = vand.u32 4294901760, %v1591_v31 }
 0x1d3   :  { %2311 = vrcp.f32 %v1510_v55 }
 0x1d4   :  { %2313 = vtanh.f32 %v1501_v2 }
 0x1df   :  { %v2310_v4 = vpop.eup %2309 }
 0x1e0   :  { %v2312_v14 = vpop.eup %2311  ;;  %v1517_v19 = vmul.f32 %v2310_v4, %v2308_v30 }
 0x1e1   :  { %v2314_v20 = vpop.eup %2313 }
 0x1e2   :  { %v1518_v21 = vmul.f32 %v2314_v20, %v2312_v14  ;;  %1575 = vrot.lane.b32.xlu1 %v1517_v19, %s2363_s9  ;;  %v3121_v29 = vand.u32 4294901760, %v1517_v19 }
 0x1e4   :  { %1577 = vrot.lane.b32.xlu0 %v1518_v21, %s2363_s9  ;;  %v3119_v27 = vand.u32 4294901760, %v1518_v21  ;;  %v3145_v0 = vsub.f32 %v1517_v19, %v3121_v29 }
 0x1e6   :  { %1567 = vrot.lane.b32.xlu1 %v1517_v19, %s2362_s8  ;;  %v3142_v46 = vsub.f32 %v1518_v21, %v3119_v27  ;;  %v3573_v28 = vand.u32 4294901760, %v3145_v0 }
 0x1e8   :  { %1569 = vrot.lane.b32.xlu0 %v1518_v21, %s2362_s8  ;;  %v3574_v11 = vand.u32 4294901760, %v3142_v46  ;;  %v3209_v16 = vsub.f32 %v3145_v0, %v3573_v28 }
 0x1ea   :  { %1559 = vrot.lane.b32.xlu1 %v1517_v19, %s2364_s5 }
 0x1ec   :  { %1561 = vrot.lane.b32.xlu0 %v1518_v21, %s2364_s5 }
 0x1ee   :  { %1551 = vrot.lane.b32.xlu1 %v1517_v19, %s2365_s12 }
 0x1f0   :  { %1553 = vrot.lane.b32.xlu0 %v1518_v21, %s2365_s12 }
 0x1f2   :  { %1543 = vrot.lane.b32.xlu1 %v1517_v19, %s2366_s13 }
 0x1f4   :  { %1545 = vrot.lane.b32.xlu0 %v1518_v21, %s2366_s13 }
 0x1f6   :  { %1535 = vrot.lane.b32.xlu1 %v1517_v19, %s2367_s14 }
 0x1f8   :  { %1537 = vrot.lane.b32.xlu0 %v1518_v21, %s2367_s14 }
 0x1fa   :  { %1527 = vrot.lane.b32.xlu1 %v1517_v19, %s2369_s15 }
 0x1fc   :  { %1529 = vrot.lane.b32.xlu0 %v1518_v21, %s2369_s15 }
 0x1fe   :  { %1519 = vrot.lane.b32.xlu1 %v1517_v19, %s2370_s16 }
 0x200   :  { %1521 = vrot.lane.b32.xlu0 %v1518_v21, %s2370_s16 }
 0x202   :  { %1587 = vperm.xlu1 %2302, %v1584_v22  }
 0x254   :  { %v1576_v8 = vpop.permute.xlu1 %1575 }
 0x256   :  { %v1578_v13 = vpop.permute.xlu0 %1577 }
 0x257   :  { %v1579_v40 = vsel %vm131_vm7, %v1576_v8, %v1578_v13  ;;  %v1580_v41 = vsel %vm131_vm7, %v1578_v13, %v1576_v8  ;;  %vm3653_vm7 = vcmp.lt.s32.totalorder %v3646_v39, 112 }
 0x258   :  { %v1581_v48 = vsel %vm3649_vm11, %v1579_v40, 0.0  ;;  %v1582_v54 = vsel %vm3652_vm15, %v1580_v41, 0.0  ;;  %v1568_v58 = vpop.permute.xlu1 %1567  ;;  %vm3654_vm11 = vmmov %vm3653_vm7 }
 0x259   :  { %v3137_v59 = vand.u32 4294901760, %v1582_v54  ;;  %v3139_v60 = vand.u32 4294901760, %v1581_v48  ;;  %vm3663_vm15 = vmand %vm2547_vm5, %vm2459_vm1 }
 0x25a   :  { %v1570_v61 = vpop.permute.xlu0 %1569 }
 0x25b   :  { %v3148_v1 = vsub.f32 %v1582_v54, %v3137_v59  ;;  %v3151_v9 = vsub.f32 %v1581_v48, %v3139_v60  ;;  %v1571_v10 = vsel %vm3653_vm7, %v1568_v58, %v1570_v61  ;;  %v1572_v18 = vsel %vm3654_vm11, %v1570_v61, %v1568_v58  ;;  %1608 = vmatprep.subr.mxu0 %v3137_v59  ;;  %vm3665_vm7 = vmand %vm2551_vm8, %vm2467_vm3 }
 0x25c   :  { %v1573_v25 = vsel %vm2455_vm0, %v1571_v10, 0.0  ;;  %v1574_v34 = vsel %vm2463_vm2, %v1572_v18, 0.0  ;;  %1610 = vmatpush1.msra.mxu0 %v3139_v60  ;;  %v1560_v35 = vpop.permute.xlu1 %1559  ;;  %vm3658_vm0 = vcmp.lt.s32.totalorder %v3646_v39, 127  ;;  %v3244_v58 = vsub.f32 %v3142_v46, %v3574_v11  ;;  %vm3669_vm11 = vmand %vm2551_vm8, %vm2496_vm12 }
 0x25d   :  { %v1709_v36 = vand.u32 4294901760, %v3151_v9  ;;  %v3164_v37 = vand.u32 4294901760, %v1574_v34  ;;  %v3166_v57 = vand.u32 4294901760, %v1573_v25  ;;  %v1703_v62 = vand.u32 4294901760, %v3148_v1  ;;  %vm3659_vm2 = vmmov %vm3658_vm0 }
 0x25e   :  { %v1562_v7 = vpop.permute.xlu0 %1561  ;;  %v3247_v61 = vsub.f32 %v1591_v31, %v3211_v24 }
 0x25f   :  { %v3173_v43 = vsub.f32 %v1574_v34, %v3164_v37  ;;  %v3176_v44 = vsub.f32 %v1573_v25, %v3166_v57  ;;  %v1563_v52 = vsel %vm113_vm10, %v1560_v35, %v1562_v7  ;;  %v1564_v63 = vsel %vm113_vm10, %v1562_v7, %v1560_v35  ;;  %1612 = vmatprep.subr.mxu0 %v3164_v37 }
 0x260   :  { %v1565_v38 = vsel %vm60_vm13, %v1563_v52, 0.0  ;;  %v1566_v6 = vsel %vm3657_vm4, %v1564_v63, 0.0  ;;  %1614 = vmatpush1.msra.mxu0 %v3166_v57  ;;  %v1552_v3 = vpop.permute.xlu1 %1551  ;;  %v1704_v47 = vsub.f32 %v3148_v1, %v1703_v62  ;;  %v1710_v15 = vsub.f32 %v3151_v9, %v1709_v36 }
 0x261   :  { %v1721_v26 = vand.u32 4294901760, %v3176_v44  ;;  %v3201_v50 = vand.u32 4294901760, %v1566_v6  ;;  %v3203_v53 = vand.u32 4294901760, %v1565_v38  ;;  %v1715_v17 = vand.u32 4294901760, %v3173_v43 }
 0x262   :  { %v1554_v55 = vpop.permute.xlu0 %1553  ;;  %v1705_v56 = vand.u32 4294901760, %v1704_v47  ;;  %v1711_v33 = vand.u32 4294901760, %v1710_v15  ;;  %vm3660_vm10 = vcmp.lt.s32.totalorder %v3646_v39, 1 }
 0x263   :  { %v3214_v2 = vsub.f32 %v1566_v6, %v3201_v50  ;;  %v3217_v30 = vsub.f32 %v1565_v38, %v3203_v53  ;;  %v1555_v4 = vsel %vm3658_vm0, %v1552_v3, %v1554_v55  ;;  %v1556_v14 = vsel %vm3659_vm2, %v1554_v55, %v1552_v3  ;;  %1616 = vmatprep.subr.mxu0 %v3201_v50  ;;  %vm3661_vm13 = vmmov %vm3660_vm10 }
 0x264   :  { %v1557_v19 = vsel %vm2459_vm1, %v1555_v4, 0.0  ;;  %v1558_v20 = vsel %vm2467_vm3, %v1556_v14, 0.0  ;;  %1706 = vmatprep.subr.mxu1 %v1705_v56  ;;  %1618 = vmatpush1.msra.mxu0 %v3203_v53  ;;  %v1544_v21 = vpop.permute.xlu1 %1543  ;;  %v1716_v22 = vsub.f32 %v3173_v43, %v1715_v17  ;;  %v1722_v8 = vsub.f32 %v3176_v44, %v1721_v26 }
 0x265   :  { %v1733_v13 = vand.u32 4294901760, %v3217_v30  ;;  %v3236_v40 = vand.u32 4294901760, %v1558_v20  ;;  %v3238_v41 = vand.u32 4294901760, %v1557_v19  ;;  %1712 = vmatpush1.msra.mxu1 %v1711_v33  ;;  %v1727_v42 = vand.u32 4294901760, %v3214_v2 }
 0x266   :  { %v1546_v48 = vpop.permute.xlu0 %1545  ;;  %v1717_v49 = vand.u32 4294901760, %v1716_v22  ;;  %v1723_v54 = vand.u32 4294901760, %v1722_v8  ;;  %v1759_v56 = vand.u32 4294901760, %v3209_v16  ;;  %v3577_v33 = vand.u32 4294901760, %v3247_v61 }
 0x267   :  { %v3250_v10 = vsub.f32 %v1558_v20, %v3236_v40  ;;  %v3253_v18 = vsub.f32 %v1557_v19, %v3238_v41  ;;  %v1547_v23 = vsel %vm3660_vm10, %v1544_v21, %v1546_v48  ;;  %v1548_v25 = vsel %vm3661_vm13, %v1546_v48, %v1544_v21  ;;  %1620 = vmatprep.subr.mxu0 %v3236_v40 }
 0x268   :  { %v1549_v34 = vsel %vm2490_vm9, %v1548_v25, 0.0  ;;  %v1550_v35 = vsel %vm2496_vm12, %v1547_v23, 0.0  ;;  %1718 = vmatprep.subr.mxu1 %v1717_v49  ;;  %1622 = vmatpush1.msra.mxu0 %v3238_v41  ;;  %v1536_v7 = vpop.permute.xlu1 %1535  ;;  %v1728_v31 = vsub.f32 %v3214_v2, %v1727_v42  ;;  %v1734_v52 = vsub.f32 %v3217_v30, %v1733_v13 }
 0x269   :  { %v1745_v63 = vand.u32 4294901760, %v3253_v18  ;;  %v3272_v38 = vand.u32 4294901760, %v1550_v35  ;;  %v3274_v6 = vand.u32 4294901760, %v1549_v34  ;;  %1724 = vmatpush1.msra.mxu1 %v1723_v54  ;;  %1624 = vmatprep.subr.mxu0 %v3119_v27  ;;  %v1739_v3 = vand.u32 4294901760, %v3250_v10 }
 0x26a   :  { %v1538_v47 = vpop.permute.xlu0 %1537  ;;  %1626 = vmatpush1.msra.mxu0 %v3121_v29  ;;  %v1729_v15 = vand.u32 4294901760, %v1728_v31  ;;  %v1735_v55 = vand.u32 4294901760, %v1734_v52  ;;  %v1753_v31 = vand.u32 4294901760, %v3244_v58  ;;  %v1679_v52 = vsub.f32 %v3247_v61, %v3577_v33 }
 0x26b   :  { %v3282_v4 = vsub.f32 %v1550_v35, %v3272_v38  ;;  %v3285_v14 = vsub.f32 %v1549_v34, %v3274_v6  ;;  %v1539_v19 = vsel %vm86_vm6, %v1536_v7, %v1538_v47  ;;  %v1540_v20 = vsel %vm86_vm6, %v1538_v47, %v1536_v7  ;;  %1628 = vmatprep.subr.mxu0 %v3272_v38  ;;  %vm3668_vm6 = vmand %vm2547_vm5, %vm2490_vm9 }
 0x26c   :  { %v1541_v16 = vsel %vm3663_vm15, %v1540_v20, 0.0  ;;  %v1542_v8 = vsel %vm3665_vm7, %v1539_v19, 0.0  ;;  %1730 = vmatprep.subr.mxu1 %v1729_v15  ;;  %v1528_v48 = vpop.permute.xlu1 %1527  ;;  %1630 = vmatpush1.msra.mxu0 %v3274_v6  ;;  %v1740_v49 = vsub.f32 %v3250_v10, %v1739_v3  ;;  %v1746_v45 = vsub.f32 %v3253_v18, %v1745_v63 }
 0x26d   :  { %v3576_v54 = vand.u32 4294901760, %v3285_v14  ;;  %v3310_v23 = vand.u32 4294901760, %v1542_v8  ;;  %v3312_v25 = vand.u32 4294901760, %v1541_v16  ;;  %1736 = vmatpush1.msra.mxu1 %v1735_v55  ;;  %v3575_v51 = vand.u32 4294901760, %v3282_v4 }
 0x26e   :  { %v1530_v34 = vpop.permute.xlu0 %1529  ;;  %v1741_v35 = vand.u32 4294901760, %v1740_v49  ;;  %v1747_v7 = vand.u32 4294901760, %v1746_v45  ;;  %vm3666_vm1 = vcmp.lt.s32.totalorder %v3646_v39, 16  ;;  %v1680_v11 = vand.u32 4294901760, %v1679_v52 }
 0x26f   :  { %v3320_v47 = vsub.f32 %v1542_v8, %v3310_v23  ;;  %v3323_v15 = vsub.f32 %v1541_v16, %v3312_v25  ;;  %v1531_v55 = vsel %vm3666_vm1, %v1528_v48, %v1530_v34  ;;  %vm3667_vm3 = vmmov %vm3666_vm1  ;;  %1632 = vmatprep.subr.mxu0 %v3310_v23  ;;  %v1764_v16 = vsub.f32 %v3282_v4, %v3575_v51 }
 0x270   :  { %v1532_v19 = vsel %vm3667_vm3, %v1530_v34, %v1528_v48  ;;  %v1534_v20 = vsel %vm2551_vm8, %v1531_v55, 0.0  ;;  %1742 = vmatprep.subr.mxu1 %v1741_v35  ;;  %1634 = vmatpush1.msra.mxu0 %v3312_v25  ;;  %v1770_v8 = vsub.f32 %v3285_v14, %v3576_v54  ;;  %v1520_v35 = vpop.permute.xlu1 %1519 }
 0x271   :  { %v1533_v58 = vsel %vm2547_vm5, %v1532_v19, 0.0  ;;  %v1781_v48 = vand.u32 4294901760, %v3323_v15  ;;  %v3342_v49 = vand.u32 4294901760, %v1534_v20  ;;  %1748 = vmatpush1.msra.mxu1 %v1747_v7  ;;  %v1775_v34 = vand.u32 4294901760, %v3320_v47 }
 0x272   :  { %v3344_v45 = vand.u32 4294901760, %v1533_v58  ;;  %1754 = vmatprep.subr.mxu1 %v1753_v31  ;;  %v1522_v55 = vpop.permute.xlu0 %1521  ;;  %v1765_v19 = vand.u32 4294901760, %v1764_v16  ;;  %v1771_v28 = vand.u32 4294901760, %v1770_v8 }
 0x273   :  { %v3348_v51 = vsub.f32 %v1534_v20, %v3342_v49  ;;  %v1523_v33 = vsel %vm68_vm14, %v1520_v35, %v1522_v55  ;;  %v1524_v7 = vsel %vm68_vm14, %v1522_v55, %v1520_v35  ;;  %1760 = vmatpush1.msra.mxu1 %v1759_v56  ;;  %1636 = vmatprep.subr.mxu0 %v3342_v49 }
 0x274   :  { %v3351_v54 = vsub.f32 %v1533_v58, %v3344_v45  ;;  %v1525_v31 = vsel %vm3668_vm6, %v1524_v7, 0.0  ;;  %v1526_v52 = vsel %vm3669_vm11, %v1523_v33, 0.0  ;;  %1766 = vmatprep.subr.mxu1 %v1765_v19  ;;  %v1776_v39 = vsub.f32 %v3320_v47, %v1775_v34  ;;  %1638 = vmatpush1.msra.mxu0 %v3344_v45 }
 0x275   :  { %v1782_v56 = vsub.f32 %v3323_v15, %v1781_v48  ;;  %v3375_v21 = vand.u32 4294901760, %v1526_v52  ;;  %v3377_v22 = vand.u32 4294901760, %v1525_v31  ;;  %1772 = vmatpush1.msra.mxu1 %v1771_v28  ;;  %v1787_v5 = vand.u32 4294901760, %v3348_v51 }
 0x276   :  { %v1793_v32 = vand.u32 4294901760, %v3351_v54  ;;  %v1777_v33 = vand.u32 4294901760, %v1776_v39 }
 0x277   :  { %v1783_v58 = vand.u32 4294901760, %v1782_v56  ;;  %v3382_v20 = vsub.f32 %v1526_v52, %v3375_v21  ;;  %v3385_v16 = vsub.f32 %v1525_v31, %v3377_v22  ;;  %1640 = vmatprep.subr.mxu0 %v3375_v21  ;;  %v1788_v8 = vsub.f32 %v3348_v51, %v1787_v5 }
 0x278   :  { %v1794_v28 = vsub.f32 %v3351_v54, %v1793_v32  ;;  %1778 = vmatprep.subr.mxu1 %v1777_v33  ;;  %1642 = vmatpush1.msra.mxu0 %v3377_v22 }
 0x279   :  { %v1805_v35 = vand.u32 4294901760, %v3385_v16  ;;  %1784 = vmatpush1.msra.mxu1 %v1783_v58  ;;  %1681 = vmatmul.mubr.f32.vlgmr.msra.gmra.mxu0 %v1680_v11  ;;  %v1789_v55 = vand.u32 4294901760, %v1788_v8  ;;  %v1799_v7 = vand.u32 4294901760, %v3382_v20 }
 0x27a   :  { %v1795_v19 = vand.u32 4294901760, %v1794_v28  ;;  %1865 = vmatprep.subr.mxu0 %v3148_v1  ;;  %1949 = vmatprep.mubr.f32.mxu0 %v3624_v12  ;;  %v3670_v1 = vand.u32 4294901760, %v3247_v61 }
 0x27b   :  { %1868 = vmatpush1.msra.mxu0 %v3151_v9  ;;  %1790 = vmatprep.subr.mxu1 %v1789_v55  ;;  %v1800_v31 = vsub.f32 %v3382_v20, %v1799_v7  ;;  %v1806_v52 = vsub.f32 %v3385_v16, %v1805_v35  ;;  %v3671_v9 = vand.u32 4294901760, %v3142_v46 }
 0x27c   :  { %1871 = vmatprep.subr.mxu0 %v3173_v43  ;;  %1796 = vmatpush1.msra.mxu1 %v1795_v19  ;;  %v3674_v43 = vand.u32 4294901760, %v3285_v14 }
 0x27d   :  { %1874 = vmatpush1.msra.mxu0 %v3176_v44  ;;  %v1801_v11 = vand.u32 4294901760, %v1800_v31  ;;  %v1807_v39 = vand.u32 4294901760, %v1806_v52 }
 0x27e   :  { %1877 = vmatprep.subr.mxu0 %v3214_v2 }
 0x27f   :  { %1880 = vmatpush1.msra.mxu0 %v3217_v30  ;;  %1802 = vmatprep.subr.mxu1 %v1801_v11 }
 0x280   :  { %1883 = vmatprep.subr.mxu0 %v3250_v10  ;;  %1808 = vmatpush1.msra.mxu1 %v1807_v39 }
 0x281   :  { %1886 = vmatpush1.msra.mxu0 %v3253_v18  ;;  %1843 = vmatmul.mubr.f32.vlgmr.msra.gmra.mxu1 %v3211_v24 }
 0x282   :  { %1889 = vmatprep.subr.mxu0 %v3142_v46  ;;  %1973 = vmatprep.subr.mxu1 %v3137_v59  ;;  %v1588_v46 = vpop.permute.xlu1 %1587 }
 0x283   :  { %1892 = vmatpush1.msra.mxu0 %v3145_v0  ;;  %1975 = vmatpush1.msra.mxu1 %v3139_v60 }
 0x284   :  { %1895 = vmatprep.subr.mxu0 %v3282_v4  ;;  %1977 = vmatprep.subr.mxu1 %v3164_v37 }
 0x285   :  { %1898 = vmatpush1.msra.mxu0 %v3285_v14  ;;  %1979 = vmatpush1.msra.mxu1 %v3166_v57  ;;  %v2316_v14 = vld [vmem:[%s3512_s0 + $0x8] sm:$0xff] }
 0x286   :  { %1901 = vmatprep.subr.mxu0 %v3320_v47  ;;  %1981 = vmatprep.subr.mxu1 %v3201_v50 }
 0x287   :  { %1904 = vmatpush1.msra.mxu0 %v3323_v15  ;;  %1983 = vmatpush1.msra.mxu1 %v3203_v53 }
 0x288   :  { %1907 = vmatprep.subr.mxu0 %v3348_v51  ;;  %1985 = vmatprep.subr.mxu1 %v3236_v40 }
 0x289   :  { %1910 = vmatpush1.msra.mxu0 %v3351_v54  ;;  %1987 = vmatpush1.msra.mxu1 %v3238_v41 }
 0x28a   :  { %1913 = vmatprep.subr.mxu0 %v3382_v20  ;;  %1989 = vmatprep.subr.mxu1 %v3119_v27 }
 0x28b   :  { %1916 = vmatpush1.msra.mxu0 %v3385_v16  ;;  %1991 = vmatpush1.msra.mxu1 %v3121_v29 }
 0x28c   :  { %1952 = vmatmul.mubr.f32.vlgmr.msra.gmra.mxu0 %v3247_v61  ;;  %1993 = vmatprep.subr.mxu1 %v3272_v38 }
 0x28d   :  { %2067 = vmatprep.subr.mxu0 %v1703_v62  ;;  %1995 = vmatpush1.msra.mxu1 %v3274_v6  ;;  %v3673_v62 = vand.u32 4294901760, %v3282_v4 }
 0x28e   :  { %2071 = vmatpush1.msra.mxu0 %v1709_v36  ;;  %1997 = vmatprep.subr.mxu1 %v3310_v23  ;;  %v3672_v36 = vand.u32 4294901760, %v3145_v0 }
 0x28f   :  { %2075 = vmatprep.subr.mxu0 %v1715_v17  ;;  %1999 = vmatpush1.msra.mxu1 %v3312_v25 }
 0x290   :  { %2079 = vmatpush1.msra.mxu0 %v1721_v26  ;;  %2001 = vmatprep.subr.mxu1 %v3342_v49 }
 0x291   :  { %2083 = vmatprep.subr.mxu0 %v1727_v42  ;;  %2003 = vmatpush1.msra.mxu1 %v3344_v45 }
 0x292   :  { %2087 = vmatpush1.msra.mxu0 %v1733_v13  ;;  %2005 = vmatprep.subr.mxu1 %v3375_v21 }
 0x293   :  { %2091 = vmatprep.subr.mxu0 %v1739_v3  ;;  %2007 = vmatpush1.msra.mxu1 %v3377_v22 }
 0x294   :  { %2040 = vmatprep.mubr.f32.mxu1 %v3624_v12  ;;  %2095 = vmatpush1.msra.mxu0 %v1745_v63 }
 0x295   :  { %2044 = vmatmul.mubr.f32.vlgmr.msra.gmra.mxu1 %v3670_v1  ;;  %2099 = vmatprep.subr.mxu0 %v3671_v9 }
 0x296   :  { %2191 = vmatprep.subr.mxu1 %v3137_v59  ;;  %2103 = vmatpush1.msra.mxu0 %v3672_v36 }
 0x297   :  { %2193 = vmatpush1.msra.mxu1 %v3139_v60  ;;  %2107 = vmatprep.subr.mxu0 %v3673_v62 }
 0x298   :  { %2195 = vmatprep.subr.mxu1 %v3164_v37  ;;  %2111 = vmatpush1.msra.mxu0 %v3674_v43 }
 0x299   :  { %2197 = vmatpush1.msra.mxu1 %v3166_v57  ;;  %2115 = vmatprep.subr.mxu0 %v1775_v34 }
 0x29a   :  { %2199 = vmatprep.subr.mxu1 %v3201_v50  ;;  %2119 = vmatpush1.msra.mxu0 %v1781_v48 }
 0x29b   :  { %2201 = vmatpush1.msra.mxu1 %v3203_v53  ;;  %2123 = vmatprep.subr.mxu0 %v1787_v5 }
 0x29c   :  { %2203 = vmatprep.subr.mxu1 %v3236_v40  ;;  %2127 = vmatpush1.msra.mxu0 %v1793_v32 }
 0x29d   :  { %2205 = vmatpush1.msra.mxu1 %v3238_v41  ;;  %2131 = vmatprep.subr.mxu0 %v1799_v7 }
 0x29e   :  { %2207 = vmatprep.subr.mxu1 %v3119_v27  ;;  %2135 = vmatpush1.msra.mxu0 %v1805_v35 }
 0x29f   :  { %2168 = vmatprep.mubr.f32.mxu0 %v3624_v12  ;;  %2209 = vmatpush1.msra.mxu1 %v3121_v29 }
 0x2a0   :  { %2170 = vmatmul.mubr.f32.vlgmr.msra.gmra.mxu0 %v3211_v24  ;;  %2211 = vmatprep.subr.mxu1 %v3272_v38 }
 0x2a1   :  { %2213 = vmatpush1.msra.mxu1 %v3274_v6  ;;  %2258 = vmatprep.mubr.f32.mxu1 %v3624_v12  ;;  %v2315_v6 = vld [vmem:[%s3512_s0] sm:$0xff] }
 0x2a2   :  { %2215 = vmatprep.subr.mxu1 %v3310_v23 }
 0x2a3   :  { %2217 = vmatpush1.msra.mxu1 %v3312_v25 }
 0x2a4   :  { %2219 = vmatprep.subr.mxu1 %v3342_v49 }
 0x2a5   :  { %2221 = vmatpush1.msra.mxu1 %v3344_v45 }
 0x2a6   :  { %2223 = vmatprep.subr.mxu1 %v3375_v21 }
 0x2a7   :  { %2225 = vmatpush1.msra.mxu1 %v3377_v22 }
 0x2a8   :  { %2260 = vmatmul.mubr.f32.vlgmr.msra.gmra.mxu1 %v3211_v24 }
 0x339   :  { %v1682_v27 = vpop.f32.mrf.mxu0 }
 0x33a   :  { %v1683_v0 = vadd.f32 %v1682_v27, %v1588_v46 }
 0x33b   :  { %v1684_v29 = vpop.f32.mrf.mxu0 }
 0x33c   :  { %v1685_v44 = vadd.f32 %v1684_v29, %v1588_v46 }
 0x341   :  { %v1844_v59 = vpop.f32.mrf.mxu1 }
 0x342   :  { %v1845_v26 = vadd.f32 %v1844_v59, %v1683_v0 }
 0x343   :  { %v1846_v12 = vpop.f32.mrf.mxu1 }
 0x344   :  { %v1847_v53 = vadd.f32 %v1846_v12, %v1685_v44 }
 0x34c   :  { %v1953_v60 = vpop.f32.mrf.mxu0 }
 0x34d   :  { %v1954_v17 = vadd.f32 %v1953_v60, %v1845_v26 }
 0x34e   :  { %v1955_v37 = vpop.f32.mrf.mxu0 }
 0x34f   :  { %v1956_v30 = vadd.f32 %v1955_v37, %v1847_v53 }
 0x355   :  { %v2045_v57 = vpop.f32.mrf.mxu1 }
 0x356   :  { %v2046_v13 = vadd.f32 %v2045_v57, %v1954_v17 }
 0x357   :  { %v2047_v2 = vpop.f32.mrf.mxu1 }
 0x358   :  { %v2048_v41 = vadd.f32 %v2047_v2, %v1956_v30 }
 0x360   :  { %v2171_v50 = vpop.f32.mrf.mxu0 }
 0x361   :  { %v2172_v24 = vadd.f32 %v2171_v50, %v2046_v13 }
 0x362   :  { %v2173_v40 = vpop.f32.mrf.mxu0 }
 0x363   :  { %v2174_v61 = vadd.f32 %v2173_v40, %v2048_v41 }
 0x368   :  { %v2261_v42 = vpop.f32.mrf.mxu1 }
 0x369   :  { %v2262_v10 = vadd.f32 %v2261_v42, %v2172_v24 }
 0x36a   :  { %v2263_v18 = vpop.f32.mrf.mxu1 }
 0x36b   :  { %v2266_v63 = vmax.f32 %v2262_v10, 0.0  ;;  %v2264_v38 = vadd.f32 %v2263_v18, %v2174_v61 }
 0x36d   :  { %v2268_v3 = vadd.f32 %v2315_v6, %v2266_v63  ;;  %v2267_v4 = vmax.f32 %v2264_v38, 0.0 }
 0x36f   :  { %2270 = vst [vmem:[#allocation5] sm:$0xff] %v2268_v3  ;;  %v2269_v54 = vadd.f32 %v2316_v14, %v2267_v4 }
 0x371   :  { %2271 = vst [vmem:[#allocation5 + $0x8] sm:$0xff] %v2269_v54 }
 0x372   :  { %2348 = shalt.err (!%p2345_p9)
}
 0x373   :  { %2281 = dma.vmem_to_hbm [thread:$0]  %s2279_s23, 256, %s3519_s7, [#allocation4]  }
 0x374   :  { %2359 = dma.done.wait [#allocation4], 256  }
 0x375   :  { %2360 = vsyncadd [#allocation4], 4294967040 }
 0x376   :  { %2285 = vsyncpa [#allocation3], 1 }
 0x377   :  { %2286 = vsyncpa [#allocation4], 1 }

</bundles_post_ra>
